<compile_context>
chip_gen: v7x
topology: tpu7x:2x2x1
jax: 0.10.0
libtpu: 0.0.40
codegen_flags: <defaults>
</compile_context>

<pallas_src>
import jax
import jax.numpy as jnp
import numpy as np
from jax.experimental import pallas as pl
from jax.experimental.pallas import tpu as pltpu  # noqa: F401  (imported per harness convention)

HIDDEN = 32
EMBED = 64
I3D_TIME = 4

B_PAD = 8                      # batch padded to one full sublane block
GATE_BLK = 128                 # each GRU gate (r/z/n) gets its own 128-lane block
GATE_W = 3 * GATE_BLK          # 384
EMB_PAD = 128                  # embed width 64 padded to 128 lanes (and h carried 128-wide)

# Head dimensions (phase / instrument / action).
PH_H, PH_O = 16, 7
IN_H, IN_O = 24, 21
AC_H, AC_O = 8, 4
HEAD_H = PH_H + IN_H + AC_H    # 48  (fused first-layer width)
HEAD_O = PH_O + IN_O + AC_O    # 32  (packed head output width)
OUT_PAD = 128                  # packed output padded to a full 128-lane store


def _rup8(n):
    return (n + 7) // 8 * 8


# ---------------------------------------------------------------------------
# Fused kernel: embed -> GRU -> upsample -> fused heads   (single invocation, no grid)
# ---------------------------------------------------------------------------
def make_fused_kernel(T, d_pad, n_out_rows, offsets):
    TB = T * B_PAD
    WI_R, WH_R, BI_R, BH_R = offsets["gates"]
    EW_R, EB_R, UP_R, W1_R, B1_R, W2_R, B2_R = offsets["misc"]

    def kernel(x_ref, g_ref, m_ref, out_ref):
        # ---- Embed: relu(x @ W + b) on the whole (T*8, d_pad) slab ----
        emb = jnp.maximum(
            jnp.dot(x_ref[...], m_ref[EW_R:EW_R + d_pad, :],
                    preferred_element_type=jnp.float32)
            + m_ref[EB_R:EB_R + 1, :], 0.0)                          # (TB, 128)

        # ---- Hoisted GRU input gates for ALL timesteps (off the serial path) ----
        gi_all = (jnp.dot(emb, g_ref[WI_R:WI_R + EMB_PAD, :],
                          preferred_element_type=jnp.float32)
                  + g_ref[BI_R:BI_R + 1, :])                         # (TB, 384)

        wh = g_ref[WH_R:WH_R + EMB_PAD, :]                           # (128, 384)
        bh = g_ref[BH_R:BH_R + 1, :]                                 # (1, 384)

        # ---- GRU recurrence: only gh = h @ W_hh stays serial; every slice is
        #      8-sublane / 128-lane aligned (no sublane or lane shuffles). ----
        h = jnp.zeros((B_PAD, EMB_PAD), jnp.float32)                 # lanes 0:32 real
        hs = []
        for t in range(T):                                           # static unroll
            gi = gi_all[t * B_PAD:(t + 1) * B_PAD, :]                # (8, 384)
            gh = jnp.dot(h, wh, preferred_element_type=jnp.float32) + bh
            r = jax.nn.sigmoid(gi[:, 0:GATE_BLK] + gh[:, 0:GATE_BLK])
            z = jax.nn.sigmoid(gi[:, GATE_BLK:2 * GATE_BLK]
                               + gh[:, GATE_BLK:2 * GATE_BLK])
            n = jnp.tanh(gi[:, 2 * GATE_BLK:] + r * gh[:, 2 * GATE_BLK:])
            h = (1.0 - z) * n + z * h
            hs.append(h)
        hs_cat = jnp.concatenate(hs, axis=0)                         # (TB, 128)

        # ---- Bilinear time-upsample + batch de-interleave: ONE block-sparse matmul
        #      (rows already in batch-major (b, t_out) order for the output). ----
        up = jnp.dot(m_ref[UP_R:UP_R + n_out_rows, 0:TB], hs_cat,
                     preferred_element_type=jnp.float32)             # (n_out_rows, 128)

        # ---- Fused heads: one (128,128) matmul + one block-diagonal (128,128) matmul
        #      ending in a single unmasked lane-dense store. ----
        a1 = jnp.maximum(
            jnp.dot(up, m_ref[W1_R:W1_R + EMB_PAD, :],
                    preferred_element_type=jnp.float32)
            + m_ref[B1_R:B1_R + 1, :], 0.0)                          # (n_out_rows, 128)
        out_ref[...] = (jnp.dot(a1, m_ref[W2_R:W2_R + EMB_PAD, :],
                                preferred_element_type=jnp.float32)
                        + m_ref[B2_R:B2_R + 1, :])                   # (n_out_rows, 128)

    return kernel


# ---------------------------------------------------------------------------
# One-time host-side parameter packing (outside jit)
# ---------------------------------------------------------------------------
def bilinear_upsample_matrix(t_in, t_out):
    """UpsamplingBilinear2d (align_corners=True) along time as a (t_out, t_in) matrix."""
    m = np.zeros((t_out, t_in), np.float32)
    if t_in == 1 or t_out == 1:
        m[:, 0] = 1.0
        return m
    scale = (t_in - 1) / (t_out - 1)
    for i in range(t_out):
        src = i * scale
        i0 = int(np.floor(src))
        i1 = min(i0 + 1, t_in - 1)
        w = src - i0
        m[i, i0] += 1.0 - w
        m[i, i1] += w
    return m


def prepare_params(params, input_dim, B, T, T_out):
    """Pack all weights/biases into two pre-padded slabs (runs once, numpy)."""
    H = HIDDEN
    d_pad = _rup8(input_dim)
    n_out_rows = _rup8(B * T_out)

    def np_(a):
        return np.asarray(a, np.float32)

    def gate_pad(w, rows_pad):
        # (rows, 3H) -> (rows_pad, 384) with each gate in its own 128-lane block.
        w = np_(w)
        out = np.zeros((rows_pad, GATE_W), np.float32)
        for g in range(3):
            out[:w.shape[0], g * GATE_BLK:g * GATE_BLK + H] = w[:, g * H:(g + 1) * H]
        return out

    # -- gates slab (width 384): W_ih | W_hh | b_ih | b_hh
    gates_blocks = [gate_pad(params["gru_wi"], EMB_PAD),
                    gate_pad(params["gru_wh"], EMB_PAD),
                    gate_pad(params["gru_bi"], 8),
                    gate_pad(params["gru_bh"], 8)]
    g_offs, acc = [], 0
    for blk in gates_blocks:
        g_offs.append(acc)
        acc += blk.shape[0]
    gates_slab = np.concatenate(gates_blocks, axis=0)                # (272, 384)

    # -- misc slab (width 128): embed, upsample matrix, fused heads
    misc_blocks, m_offs = [], []

    def add(block):
        m_offs.append(sum(b.shape[0] for b in misc_blocks))
        misc_blocks.append(block)

    ew = np.zeros((d_pad, 128), np.float32)
    ew[:input_dim, :EMBED] = np_(params["emb_w"])
    add(ew)

    eb = np.zeros((8, 128), np.float32)
    eb[0, :EMBED] = np_(params["emb_b"])[0]
    add(eb)

    # Batch-major block-sparse interpolation matrix: output row b*T_out + t_out reads
    # column t*B_PAD + b of the time-major hidden-state stack.
    wup = bilinear_upsample_matrix(T, T_out)                         # (T_out, T)
    wup_big = np.zeros((n_out_rows, 128), np.float32)
    for b in range(B):
        wup_big[b * T_out:(b + 1) * T_out, b:T * B_PAD:B_PAD] = wup
    add(wup_big)

    w1 = np.zeros((EMB_PAD, 128), np.float32)
    w1[:H, 0:PH_H] = np_(params["ph_w1"])
    w1[:H, PH_H:PH_H + IN_H] = np_(params["in_w1"])
    w1[:H, PH_H + IN_H:HEAD_H] = np_(params["ac_w1"])
    add(w1)

    b1 = np.zeros((8, 128), np.float32)
    b1[0, 0:PH_H] = np_(params["ph_b1"])[0]
    b1[0, PH_H:PH_H + IN_H] = np_(params["in_b1"])[0]
    b1[0, PH_H + IN_H:HEAD_H] = np_(params["ac_b1"])[0]
    add(b1)

    w2 = np.zeros((EMB_PAD, 128), np.float32)                        # block-diagonal
    w2[0:PH_H, 0:PH_O] = np_(params["ph_w2"])
    w2[PH_H:PH_H + IN_H, PH_O:PH_O + IN_O] = np_(params["in_w2"])
    w2[PH_H + IN_H:HEAD_H, PH_O + IN_O:HEAD_O] = np_(params["ac_w2"])
    add(w2)

    b2 = np.zeros((8, 128), np.float32)
    b2[0, 0:PH_O] = np_(params["ph_b2"])[0]
    b2[0, PH_O:PH_O + IN_O] = np_(params["in_b2"])[0]
    b2[0, PH_O + IN_O:HEAD_O] = np_(params["ac_b2"])[0]
    add(b2)

    misc_slab = np.concatenate(misc_blocks, axis=0)                  # (360, 128)

    offsets = {"gates": tuple(g_offs), "misc": tuple(m_offs)}
    return jnp.asarray(gates_slab), jnp.asarray(misc_slab), offsets, d_pad, n_out_rows


# ---------------------------------------------------------------------------
# Forward wrapper
# ---------------------------------------------------------------------------
def make_forward(B, T, D, T_out, d_pad, n_out_rows, offsets):
    kernel = make_fused_kernel(T, d_pad, n_out_rows, offsets)

    @jax.jit
    def forward(x, gates_slab, misc_slab):
        # Time-major rows (row = t*B_PAD + b), batch padded to 8 sublanes, feature
        # padded to d_pad.  Only the tiny raw input is reshaped per call; all weights
        # were packed once in prepare_params.
        x_tm = jnp.zeros((T, B_PAD, d_pad), jnp.float32)
        x_tm = x_tm.at[:, :B, :D].set(jnp.transpose(x, (1, 0, 2)))
        x_tm = x_tm.reshape(T * B_PAD, d_pad)

        # No grid / default whole-array VMEM blocks: 3 input DMAs + 1 output DMA total.
        out = pl.pallas_call(
            kernel,
            out_shape=jax.ShapeDtypeStruct((n_out_rows, OUT_PAD), jnp.float32),
        )(x_tm, gates_slab, misc_slab)

        out3 = out[:B * T_out].reshape(B, T_out, OUT_PAD)
        return (out3[:, :, 0:PH_O],
                out3[:, :, PH_O:PH_O + IN_O],
                out3[:, :, PH_O + IN_O:HEAD_O])

    return forward


# ---------------------------------------------------------------------------
# Parameter init (original, unfused / unpadded layout) + pure-JAX reference
# ---------------------------------------------------------------------------
def init_params(key, input_dim):
    ks = jax.random.split(key, 20)
    s = 0.1

    def rnd(k, shape):
        return jax.random.normal(k, shape, jnp.float32) * s

    return {
        # EmbedModule: Linear(input_dim, 64)   (weights stored as (in, out))
        "emb_w": rnd(ks[0], (input_dim, EMBED)),
        "emb_b": rnd(ks[1], (1, EMBED)),
        # GRU: gate order along columns is [r | z | n]
        "gru_wi": rnd(ks[2], (EMBED, 3 * HIDDEN)),
        "gru_wh": rnd(ks[3], (HIDDEN, 3 * HIDDEN)),
        "gru_bi": rnd(ks[4], (1, 3 * HIDDEN)),
        "gru_bh": rnd(ks[5], (1, 3 * HIDDEN)),
        # phase head: 32 -> 16 -> 7
        "ph_w1": rnd(ks[6], (HIDDEN, PH_H)), "ph_b1": rnd(ks[7], (1, PH_H)),
        "ph_w2": rnd(ks[8], (PH_H, PH_O)), "ph_b2": rnd(ks[9], (1, PH_O)),
        # instrument head: 32 -> 24 -> 21
        "in_w1": rnd(ks[10], (HIDDEN, IN_H)), "in_b1": rnd(ks[11], (1, IN_H)),
        "in_w2": rnd(ks[12], (IN_H, IN_O)), "in_b2": rnd(ks[13], (1, IN_O)),
        # action head: 32 -> 8 -> 4
        "ac_w1": rnd(ks[14], (HIDDEN, AC_H)), "ac_b1": rnd(ks[15], (1, AC_H)),
        "ac_w2": rnd(ks[16], (AC_H, AC_O)), "ac_b2": rnd(ks[17], (1, AC_O)),
    }


def reference_forward(x, params, wup):
    with jax.default_matmul_precision("highest"):
        emb = jax.nn.relu(x @ params["emb_w"] + params["emb_b"])     # (B, T, 64)
        B, T, _ = emb.shape
        H = HIDDEN

        def step(h, xt):
            gi = xt @ params["gru_wi"] + params["gru_bi"]
            gh = h @ params["gru_wh"] + params["gru_bh"]
            r = jax.nn.sigmoid(gi[:, :H] + gh[:, :H])
            z = jax.nn.sigmoid(gi[:, H:2 * H] + gh[:, H:2 * H])
            n = jnp.tanh(gi[:, 2 * H:] + r * gh[:, 2 * H:])
            h_new = (1.0 - z) * n + z * h
            return h_new, h_new

        h0 = jnp.zeros((B, H), jnp.float32)
        _, hs = jax.lax.scan(step, h0, emb.transpose(1, 0, 2))
        hs = hs.transpose(1, 0, 2)                                   # (B, T, H)
        up = jnp.einsum("ot,bth->boh", wup, hs)                      # (B, T_out, H)

        def mlp(w1, b1, w2, b2):
            return jax.nn.relu(up @ w1 + b1) @ w2 + b2

        return (
            mlp(params["ph_w1"], params["ph_b1"], params["ph_w2"], params["ph_b2"]),
            mlp(params["in_w1"], params["in_b1"], params["in_w2"], params["in_b2"]),
            mlp(params["ac_w1"], params["ac_b1"], params["ac_w2"], params["ac_b2"]),
        )


# ---------------------------------------------------------------------------
if __name__ == "__main__":
    key = jax.random.PRNGKey(0)
    k_x, k_p = jax.random.split(key)

    B, T, INPUT_DIM = 2, 8, 16
    T_OUT = I3D_TIME * T
    x = jax.random.normal(k_x, (B, T, INPUT_DIM), jnp.float32)
    params = init_params(k_p, INPUT_DIM)

    # One-time weight packing (outside jit / off the per-call critical path).
    gates_slab, misc_slab, offsets, d_pad, n_out_rows = prepare_params(
        params, INPUT_DIM, B, T, T_OUT)
    forward = make_forward(B, T, INPUT_DIM, T_OUT, d_pad, n_out_rows, offsets)

    pred_phase, pred_instrument, pred_action = jax.block_until_ready(
        forward(x, gates_slab, misc_slab))

    wup = jnp.asarray(bilinear_upsample_matrix(T, T_OUT))
    ref_phase, ref_instrument, ref_action = reference_forward(x, params, wup)

    # Reference is pinned to 'highest' matmul precision; kernel uses default TPU
    # matmul precision -> 2e-3 tolerance covers the difference at these magnitudes.
    np.testing.assert_allclose(pred_phase, ref_phase, rtol=2e-3, atol=2e-3)
    np.testing.assert_allclose(pred_instrument, ref_instrument, rtol=2e-3, atol=2e-3)
    np.testing.assert_allclose(pred_action, ref_action, rtol=2e-3, atol=2e-3)

    assert pred_phase.shape == (B, T_OUT, 7)
    assert pred_instrument.shape == (B, T_OUT, 21)
    assert pred_action.shape == (B, T_OUT, 4)

    print("KERNEL_OK")
</pallas_src>

<mosaic_0001>
module attributes {stable_mosaic.version = 11 : i64} {
  func.func @kernel(%arg0: memref<64x16xf32, #tpu.memory_space<vmem>>, %arg1: memref<272x384xf32, #tpu.memory_space<vmem>>, %arg2: memref<360x128xf32, #tpu.memory_space<vmem>>, %arg3: memref<64x128xf32, #tpu.memory_space<vmem>>) attributes {dimension_semantics = [], scalar_prefetch = 0 : i64, scratch_operands = 0 : i64, tpu.core_type = #tpu.core_type<tc>} {
    %c0 = arith.constant 0 : index
    %c0_0 = arith.constant 0 : index
    %0 = vector.load %arg0[%c0, %c0_0] : memref<64x16xf32, #tpu.memory_space<vmem>>, vector<64x16xf32>
    %c0_1 = arith.constant 0 : index
    %c0_2 = arith.constant 0 : index
    %1 = vector.load %arg2[%c0_1, %c0_2] : memref<360x128xf32, #tpu.memory_space<vmem>>, vector<16x128xf32>
    %cst = arith.constant dense<0.000000e+00> : vector<64x128xf32>
    %2 = tpu.matmul %0, %1, %cst {dimension_numbers = #tpu.dot_dimension_numbers<[1], [0], [0], [1], [0, 0, 1, 1], [], []>} : vector<64x16xf32>, vector<16x128xf32>, vector<64x128xf32> -> vector<64x128xf32>
    %c16 = arith.constant 16 : index
    %c0_3 = arith.constant 0 : index
    %3 = vector.load %arg2[%c16, %c0_3] : memref<360x128xf32, #tpu.memory_space<vmem>>, vector<1x128xf32>
    %4 = vector.broadcast %3 : vector<1x128xf32> to vector<64x128xf32>
    %5 = arith.addf %2, %4 : vector<64x128xf32>
    %cst_4 = arith.constant 0.000000e+00 : f32
    %6 = vector.broadcast %cst_4 : f32 to vector<64x128xf32>
    %7 = arith.maximumf %5, %6 : vector<64x128xf32>
    %c0_5 = arith.constant 0 : index
    %c0_6 = arith.constant 0 : index
    %8 = vector.load %arg1[%c0_5, %c0_6] : memref<272x384xf32, #tpu.memory_space<vmem>>, vector<128x384xf32>
    %cst_7 = arith.constant dense<0.000000e+00> : vector<64x384xf32>
    %9 = tpu.matmul %7, %8, %cst_7 {dimension_numbers = #tpu.dot_dimension_numbers<[1], [0], [0], [1], [0, 0, 1, 1], [], []>} : vector<64x128xf32>, vector<128x384xf32>, vector<64x384xf32> -> vector<64x384xf32>
    %c256 = arith.constant 256 : index
    %c0_8 = arith.constant 0 : index
    %10 = vector.load %arg1[%c256, %c0_8] : memref<272x384xf32, #tpu.memory_space<vmem>>, vector<1x384xf32>
    %11 = vector.broadcast %10 : vector<1x384xf32> to vector<64x384xf32>
    %12 = arith.addf %9, %11 : vector<64x384xf32>
    %c128 = arith.constant 128 : index
    %c0_9 = arith.constant 0 : index
    %13 = vector.load %arg1[%c128, %c0_9] : memref<272x384xf32, #tpu.memory_space<vmem>>, vector<128x384xf32>
    %c264 = arith.constant 264 : index
    %c0_10 = arith.constant 0 : index
    %14 = vector.load %arg1[%c264, %c0_10] : memref<272x384xf32, #tpu.memory_space<vmem>>, vector<1x384xf32>
    %cst_11 = arith.constant 0.000000e+00 : f32
    %15 = vector.broadcast %cst_11 : f32 to vector<8x128xf32>
    %16 = vector.extract_strided_slice %12 {offsets = [0, 0], sizes = [8, 384], strides = [1, 1]} : vector<64x384xf32> to vector<8x384xf32>
    %cst_12 = arith.constant dense<0.000000e+00> : vector<8x384xf32>
    %17 = tpu.matmul %15, %13, %cst_12 {dimension_numbers = #tpu.dot_dimension_numbers<[1], [0], [0], [1], [0, 0, 1, 1], [], []>} : vector<8x128xf32>, vector<128x384xf32>, vector<8x384xf32> -> vector<8x384xf32>
    %18 = vector.broadcast %14 : vector<1x384xf32> to vector<8x384xf32>
    %19 = arith.addf %17, %18 : vector<8x384xf32>
    %20 = vector.extract_strided_slice %16 {offsets = [0, 0], sizes = [8, 128], strides = [1, 1]} : vector<8x384xf32> to vector<8x128xf32>
    %21 = vector.extract_strided_slice %19 {offsets = [0, 0], sizes = [8, 128], strides = [1, 1]} : vector<8x384xf32> to vector<8x128xf32>
    %22 = arith.addf %20, %21 : vector<8x128xf32>
    %23 = arith.negf %22 : vector<8x128xf32>
    %24 = math.exp %23 : vector<8x128xf32>
    %cst_13 = arith.constant 1.000000e+00 : f32
    %25 = vector.broadcast %cst_13 : f32 to vector<8x128xf32>
    %26 = arith.addf %25, %24 : vector<8x128xf32>
    %27 = arith.divf %25, %26 : vector<8x128xf32>
    %28 = vector.extract_strided_slice %16 {offsets = [0, 128], sizes = [8, 128], strides = [1, 1]} : vector<8x384xf32> to vector<8x128xf32>
    %29 = vector.extract_strided_slice %19 {offsets = [0, 128], sizes = [8, 128], strides = [1, 1]} : vector<8x384xf32> to vector<8x128xf32>
    %30 = arith.addf %28, %29 : vector<8x128xf32>
    %31 = arith.negf %30 : vector<8x128xf32>
    %32 = math.exp %31 : vector<8x128xf32>
    %cst_14 = arith.constant 1.000000e+00 : f32
    %33 = vector.broadcast %cst_14 : f32 to vector<8x128xf32>
    %34 = arith.addf %33, %32 : vector<8x128xf32>
    %35 = arith.divf %33, %34 : vector<8x128xf32>
    %36 = vector.extract_strided_slice %16 {offsets = [0, 256], sizes = [8, 128], strides = [1, 1]} : vector<8x384xf32> to vector<8x128xf32>
    %37 = vector.extract_strided_slice %19 {offsets = [0, 256], sizes = [8, 128], strides = [1, 1]} : vector<8x384xf32> to vector<8x128xf32>
    %38 = arith.mulf %27, %37 : vector<8x128xf32>
    %39 = arith.addf %36, %38 : vector<8x128xf32>
    %40 = math.tanh %39 : vector<8x128xf32>
    %cst_15 = arith.constant 1.000000e+00 : f32
    %41 = vector.broadcast %cst_15 : f32 to vector<8x128xf32>
    %42 = arith.subf %41, %35 : vector<8x128xf32>
    %43 = arith.mulf %42, %40 : vector<8x128xf32>
    %44 = arith.mulf %35, %15 : vector<8x128xf32>
    %45 = arith.addf %43, %44 : vector<8x128xf32>
    %46 = vector.extract_strided_slice %12 {offsets = [8, 0], sizes = [8, 384], strides = [1, 1]} : vector<64x384xf32> to vector<8x384xf32>
    %cst_16 = arith.constant dense<0.000000e+00> : vector<8x384xf32>
    %47 = tpu.matmul %45, %13, %cst_16 {dimension_numbers = #tpu.dot_dimension_numbers<[1], [0], [0], [1], [0, 0, 1, 1], [], []>} : vector<8x128xf32>, vector<128x384xf32>, vector<8x384xf32> -> vector<8x384xf32>
    %48 = vector.broadcast %14 : vector<1x384xf32> to vector<8x384xf32>
    %49 = arith.addf %47, %48 : vector<8x384xf32>
    %50 = vector.extract_strided_slice %46 {offsets = [0, 0], sizes = [8, 128], strides = [1, 1]} : vector<8x384xf32> to vector<8x128xf32>
    %51 = vector.extract_strided_slice %49 {offsets = [0, 0], sizes = [8, 128], strides = [1, 1]} : vector<8x384xf32> to vector<8x128xf32>
    %52 = arith.addf %50, %51 : vector<8x128xf32>
    %53 = arith.negf %52 : vector<8x128xf32>
    %54 = math.exp %53 : vector<8x128xf32>
    %cst_17 = arith.constant 1.000000e+00 : f32
    %55 = vector.broadcast %cst_17 : f32 to vector<8x128xf32>
    %56 = arith.addf %55, %54 : vector<8x128xf32>
    %57 = arith.divf %55, %56 : vector<8x128xf32>
    %58 = vector.extract_strided_slice %46 {offsets = [0, 128], sizes = [8, 128], strides = [1, 1]} : vector<8x384xf32> to vector<8x128xf32>
    %59 = vector.extract_strided_slice %49 {offsets = [0, 128], sizes = [8, 128], strides = [1, 1]} : vector<8x384xf32> to vector<8x128xf32>
    %60 = arith.addf %58, %59 : vector<8x128xf32>
    %61 = arith.negf %60 : vector<8x128xf32>
    %62 = math.exp %61 : vector<8x128xf32>
    %cst_18 = arith.constant 1.000000e+00 : f32
    %63 = vector.broadcast %cst_18 : f32 to vector<8x128xf32>
    %64 = arith.addf %63, %62 : vector<8x128xf32>
    %65 = arith.divf %63, %64 : vector<8x128xf32>
    %66 = vector.extract_strided_slice %46 {offsets = [0, 256], sizes = [8, 128], strides = [1, 1]} : vector<8x384xf32> to vector<8x128xf32>
    %67 = vector.extract_strided_slice %49 {offsets = [0, 256], sizes = [8, 128], strides = [1, 1]} : vector<8x384xf32> to vector<8x128xf32>
    %68 = arith.mulf %57, %67 : vector<8x128xf32>
    %69 = arith.addf %66, %68 : vector<8x128xf32>
    %70 = math.tanh %69 : vector<8x128xf32>
    %cst_19 = arith.constant 1.000000e+00 : f32
    %71 = vector.broadcast %cst_19 : f32 to vector<8x128xf32>
    %72 = arith.subf %71, %65 : vector<8x128xf32>
    %73 = arith.mulf %72, %70 : vector<8x128xf32>
    %74 = arith.mulf %65, %45 : vector<8x128xf32>
    %75 = arith.addf %73, %74 : vector<8x128xf32>
    %76 = vector.extract_strided_slice %12 {offsets = [16, 0], sizes = [8, 384], strides = [1, 1]} : vector<64x384xf32> to vector<8x384xf32>
    %cst_20 = arith.constant dense<0.000000e+00> : vector<8x384xf32>
    %77 = tpu.matmul %75, %13, %cst_20 {dimension_numbers = #tpu.dot_dimension_numbers<[1], [0], [0], [1], [0, 0, 1, 1], [], []>} : vector<8x128xf32>, vector<128x384xf32>, vector<8x384xf32> -> vector<8x384xf32>
    %78 = vector.broadcast %14 : vector<1x384xf32> to vector<8x384xf32>
    %79 = arith.addf %77, %78 : vector<8x384xf32>
    %80 = vector.extract_strided_slice %76 {offsets = [0, 0], sizes = [8, 128], strides = [1, 1]} : vector<8x384xf32> to vector<8x128xf32>
    %81 = vector.extract_strided_slice %79 {offsets = [0, 0], sizes = [8, 128], strides = [1, 1]} : vector<8x384xf32> to vector<8x128xf32>
    %82 = arith.addf %80, %81 : vector<8x128xf32>
    %83 = arith.negf %82 : vector<8x128xf32>
    %84 = math.exp %83 : vector<8x128xf32>
    %cst_21 = arith.constant 1.000000e+00 : f32
    %85 = vector.broadcast %cst_21 : f32 to vector<8x128xf32>
    %86 = arith.addf %85, %84 : vector<8x128xf32>
    %87 = arith.divf %85, %86 : vector<8x128xf32>
    %88 = vector.extract_strided_slice %76 {offsets = [0, 128], sizes = [8, 128], strides = [1, 1]} : vector<8x384xf32> to vector<8x128xf32>
    %89 = vector.extract_strided_slice %79 {offsets = [0, 128], sizes = [8, 128], strides = [1, 1]} : vector<8x384xf32> to vector<8x128xf32>
    %90 = arith.addf %88, %89 : vector<8x128xf32>
    %91 = arith.negf %90 : vector<8x128xf32>
    %92 = math.exp %91 : vector<8x128xf32>
    %cst_22 = arith.constant 1.000000e+00 : f32
    %93 = vector.broadcast %cst_22 : f32 to vector<8x128xf32>
    %94 = arith.addf %93, %92 : vector<8x128xf32>
    %95 = arith.divf %93, %94 : vector<8x128xf32>
    %96 = vector.extract_strided_slice %76 {offsets = [0, 256], sizes = [8, 128], strides = [1, 1]} : vector<8x384xf32> to vector<8x128xf32>
    %97 = vector.extract_strided_slice %79 {offsets = [0, 256], sizes = [8, 128], strides = [1, 1]} : vector<8x384xf32> to vector<8x128xf32>
    %98 = arith.mulf %87, %97 : vector<8x128xf32>
    %99 = arith.addf %96, %98 : vector<8x128xf32>
    %100 = math.tanh %99 : vector<8x128xf32>
    %cst_23 = arith.constant 1.000000e+00 : f32
    %101 = vector.broadcast %cst_23 : f32 to vector<8x128xf32>
    %102 = arith.subf %101, %95 : vector<8x128xf32>
    %103 = arith.mulf %102, %100 : vector<8x128xf32>
    %104 = arith.mulf %95, %75 : vector<8x128xf32>
    %105 = arith.addf %103, %104 : vector<8x128xf32>
    %106 = vector.extract_strided_slice %12 {offsets = [24, 0], sizes = [8, 384], strides = [1, 1]} : vector<64x384xf32> to vector<8x384xf32>
    %cst_24 = arith.constant dense<0.000000e+00> : vector<8x384xf32>
    %107 = tpu.matmul %105, %13, %cst_24 {dimension_numbers = #tpu.dot_dimension_numbers<[1], [0], [0], [1], [0, 0, 1, 1], [], []>} : vector<8x128xf32>, vector<128x384xf32>, vector<8x384xf32> -> vector<8x384xf32>
    %108 = vector.broadcast %14 : vector<1x384xf32> to vector<8x384xf32>
    %109 = arith.addf %107, %108 : vector<8x384xf32>
    %110 = vector.extract_strided_slice %106 {offsets = [0, 0], sizes = [8, 128], strides = [1, 1]} : vector<8x384xf32> to vector<8x128xf32>
    %111 = vector.extract_strided_slice %109 {offsets = [0, 0], sizes = [8, 128], strides = [1, 1]} : vector<8x384xf32> to vector<8x128xf32>
    %112 = arith.addf %110, %111 : vector<8x128xf32>
    %113 = arith.negf %112 : vector<8x128xf32>
    %114 = math.exp %113 : vector<8x128xf32>
    %cst_25 = arith.constant 1.000000e+00 : f32
    %115 = vector.broadcast %cst_25 : f32 to vector<8x128xf32>
    %116 = arith.addf %115, %114 : vector<8x128xf32>
    %117 = arith.divf %115, %116 : vector<8x128xf32>
    %118 = vector.extract_strided_slice %106 {offsets = [0, 128], sizes = [8, 128], strides = [1, 1]} : vector<8x384xf32> to vector<8x128xf32>
    %119 = vector.extract_strided_slice %109 {offsets = [0, 128], sizes = [8, 128], strides = [1, 1]} : vector<8x384xf32> to vector<8x128xf32>
    %120 = arith.addf %118, %119 : vector<8x128xf32>
    %121 = arith.negf %120 : vector<8x128xf32>
    %122 = math.exp %121 : vector<8x128xf32>
    %cst_26 = arith.constant 1.000000e+00 : f32
    %123 = vector.broadcast %cst_26 : f32 to vector<8x128xf32>
    %124 = arith.addf %123, %122 : vector<8x128xf32>
    %125 = arith.divf %123, %124 : vector<8x128xf32>
    %126 = vector.extract_strided_slice %106 {offsets = [0, 256], sizes = [8, 128], strides = [1, 1]} : vector<8x384xf32> to vector<8x128xf32>
    %127 = vector.extract_strided_slice %109 {offsets = [0, 256], sizes = [8, 128], strides = [1, 1]} : vector<8x384xf32> to vector<8x128xf32>
    %128 = arith.mulf %117, %127 : vector<8x128xf32>
    %129 = arith.addf %126, %128 : vector<8x128xf32>
    %130 = math.tanh %129 : vector<8x128xf32>
    %cst_27 = arith.constant 1.000000e+00 : f32
    %131 = vector.broadcast %cst_27 : f32 to vector<8x128xf32>
    %132 = arith.subf %131, %125 : vector<8x128xf32>
    %133 = arith.mulf %132, %130 : vector<8x128xf32>
    %134 = arith.mulf %125, %105 : vector<8x128xf32>
    %135 = arith.addf %133, %134 : vector<8x128xf32>
    %136 = vector.extract_strided_slice %12 {offsets = [32, 0], sizes = [8, 384], strides = [1, 1]} : vector<64x384xf32> to vector<8x384xf32>
    %cst_28 = arith.constant dense<0.000000e+00> : vector<8x384xf32>
    %137 = tpu.matmul %135, %13, %cst_28 {dimension_numbers = #tpu.dot_dimension_numbers<[1], [0], [0], [1], [0, 0, 1, 1], [], []>} : vector<8x128xf32>, vector<128x384xf32>, vector<8x384xf32> -> vector<8x384xf32>
    %138 = vector.broadcast %14 : vector<1x384xf32> to vector<8x384xf32>
    %139 = arith.addf %137, %138 : vector<8x384xf32>
    %140 = vector.extract_strided_slice %136 {offsets = [0, 0], sizes = [8, 128], strides = [1, 1]} : vector<8x384xf32> to vector<8x128xf32>
    %141 = vector.extract_strided_slice %139 {offsets = [0, 0], sizes = [8, 128], strides = [1, 1]} : vector<8x384xf32> to vector<8x128xf32>
    %142 = arith.addf %140, %141 : vector<8x128xf32>
    %143 = arith.negf %142 : vector<8x128xf32>
    %144 = math.exp %143 : vector<8x128xf32>
    %cst_29 = arith.constant 1.000000e+00 : f32
    %145 = vector.broadcast %cst_29 : f32 to vector<8x128xf32>
    %146 = arith.addf %145, %144 : vector<8x128xf32>
    %147 = arith.divf %145, %146 : vector<8x128xf32>
    %148 = vector.extract_strided_slice %136 {offsets = [0, 128], sizes = [8, 128], strides = [1, 1]} : vector<8x384xf32> to vector<8x128xf32>
    %149 = vector.extract_strided_slice %139 {offsets = [0, 128], sizes = [8, 128], strides = [1, 1]} : vector<8x384xf32> to vector<8x128xf32>
    %150 = arith.addf %148, %149 : vector<8x128xf32>
    %151 = arith.negf %150 : vector<8x128xf32>
    %152 = math.exp %151 : vector<8x128xf32>
    %cst_30 = arith.constant 1.000000e+00 : f32
    %153 = vector.broadcast %cst_30 : f32 to vector<8x128xf32>
    %154 = arith.addf %153, %152 : vector<8x128xf32>
    %155 = arith.divf %153, %154 : vector<8x128xf32>
    %156 = vector.extract_strided_slice %136 {offsets = [0, 256], sizes = [8, 128], strides = [1, 1]} : vector<8x384xf32> to vector<8x128xf32>
    %157 = vector.extract_strided_slice %139 {offsets = [0, 256], sizes = [8, 128], strides = [1, 1]} : vector<8x384xf32> to vector<8x128xf32>
    %158 = arith.mulf %147, %157 : vector<8x128xf32>
    %159 = arith.addf %156, %158 : vector<8x128xf32>
    %160 = math.tanh %159 : vector<8x128xf32>
    %cst_31 = arith.constant 1.000000e+00 : f32
    %161 = vector.broadcast %cst_31 : f32 to vector<8x128xf32>
    %162 = arith.subf %161, %155 : vector<8x128xf32>
    %163 = arith.mulf %162, %160 : vector<8x128xf32>
    %164 = arith.mulf %155, %135 : vector<8x128xf32>
    %165 = arith.addf %163, %164 : vector<8x128xf32>
    %166 = vector.extract_strided_slice %12 {offsets = [40, 0], sizes = [8, 384], strides = [1, 1]} : vector<64x384xf32> to vector<8x384xf32>
    %cst_32 = arith.constant dense<0.000000e+00> : vector<8x384xf32>
    %167 = tpu.matmul %165, %13, %cst_32 {dimension_numbers = #tpu.dot_dimension_numbers<[1], [0], [0], [1], [0, 0, 1, 1], [], []>} : vector<8x128xf32>, vector<128x384xf32>, vector<8x384xf32> -> vector<8x384xf32>
    %168 = vector.broadcast %14 : vector<1x384xf32> to vector<8x384xf32>
    %169 = arith.addf %167, %168 : vector<8x384xf32>
    %170 = vector.extract_strided_slice %166 {offsets = [0, 0], sizes = [8, 128], strides = [1, 1]} : vector<8x384xf32> to vector<8x128xf32>
    %171 = vector.extract_strided_slice %169 {offsets = [0, 0], sizes = [8, 128], strides = [1, 1]} : vector<8x384xf32> to vector<8x128xf32>
    %172 = arith.addf %170, %171 : vector<8x128xf32>
    %173 = arith.negf %172 : vector<8x128xf32>
    %174 = math.exp %173 : vector<8x128xf32>
    %cst_33 = arith.constant 1.000000e+00 : f32
    %175 = vector.broadcast %cst_33 : f32 to vector<8x128xf32>
    %176 = arith.addf %175, %174 : vector<8x128xf32>
    %177 = arith.divf %175, %176 : vector<8x128xf32>
    %178 = vector.extract_strided_slice %166 {offsets = [0, 128], sizes = [8, 128], strides = [1, 1]} : vector<8x384xf32> to vector<8x128xf32>
    %179 = vector.extract_strided_slice %169 {offsets = [0, 128], sizes = [8, 128], strides = [1, 1]} : vector<8x384xf32> to vector<8x128xf32>
    %180 = arith.addf %178, %179 : vector<8x128xf32>
    %181 = arith.negf %180 : vector<8x128xf32>
    %182 = math.exp %181 : vector<8x128xf32>
    %cst_34 = arith.constant 1.000000e+00 : f32
    %183 = vector.broadcast %cst_34 : f32 to vector<8x128xf32>
    %184 = arith.addf %183, %182 : vector<8x128xf32>
    %185 = arith.divf %183, %184 : vector<8x128xf32>
    %186 = vector.extract_strided_slice %166 {offsets = [0, 256], sizes = [8, 128], strides = [1, 1]} : vector<8x384xf32> to vector<8x128xf32>
    %187 = vector.extract_strided_slice %169 {offsets = [0, 256], sizes = [8, 128], strides = [1, 1]} : vector<8x384xf32> to vector<8x128xf32>
    %188 = arith.mulf %177, %187 : vector<8x128xf32>
    %189 = arith.addf %186, %188 : vector<8x128xf32>
    %190 = math.tanh %189 : vector<8x128xf32>
    %cst_35 = arith.constant 1.000000e+00 : f32
    %191 = vector.broadcast %cst_35 : f32 to vector<8x128xf32>
    %192 = arith.subf %191, %185 : vector<8x128xf32>
    %193 = arith.mulf %192, %190 : vector<8x128xf32>
    %194 = arith.mulf %185, %165 : vector<8x128xf32>
    %195 = arith.addf %193, %194 : vector<8x128xf32>
    %196 = vector.extract_strided_slice %12 {offsets = [48, 0], sizes = [8, 384], strides = [1, 1]} : vector<64x384xf32> to vector<8x384xf32>
    %cst_36 = arith.constant dense<0.000000e+00> : vector<8x384xf32>
    %197 = tpu.matmul %195, %13, %cst_36 {dimension_numbers = #tpu.dot_dimension_numbers<[1], [0], [0], [1], [0, 0, 1, 1], [], []>} : vector<8x128xf32>, vector<128x384xf32>, vector<8x384xf32> -> vector<8x384xf32>
    %198 = vector.broadcast %14 : vector<1x384xf32> to vector<8x384xf32>
    %199 = arith.addf %197, %198 : vector<8x384xf32>
    %200 = vector.extract_strided_slice %196 {offsets = [0, 0], sizes = [8, 128], strides = [1, 1]} : vector<8x384xf32> to vector<8x128xf32>
    %201 = vector.extract_strided_slice %199 {offsets = [0, 0], sizes = [8, 128], strides = [1, 1]} : vector<8x384xf32> to vector<8x128xf32>
    %202 = arith.addf %200, %201 : vector<8x128xf32>
    %203 = arith.negf %202 : vector<8x128xf32>
    %204 = math.exp %203 : vector<8x128xf32>
    %cst_37 = arith.constant 1.000000e+00 : f32
    %205 = vector.broadcast %cst_37 : f32 to vector<8x128xf32>
    %206 = arith.addf %205, %204 : vector<8x128xf32>
    %207 = arith.divf %205, %206 : vector<8x128xf32>
    %208 = vector.extract_strided_slice %196 {offsets = [0, 128], sizes = [8, 128], strides = [1, 1]} : vector<8x384xf32> to vector<8x128xf32>
    %209 = vector.extract_strided_slice %199 {offsets = [0, 128], sizes = [8, 128], strides = [1, 1]} : vector<8x384xf32> to vector<8x128xf32>
    %210 = arith.addf %208, %209 : vector<8x128xf32>
    %211 = arith.negf %210 : vector<8x128xf32>
    %212 = math.exp %211 : vector<8x128xf32>
    %cst_38 = arith.constant 1.000000e+00 : f32
    %213 = vector.broadcast %cst_38 : f32 to vector<8x128xf32>
    %214 = arith.addf %213, %212 : vector<8x128xf32>
    %215 = arith.divf %213, %214 : vector<8x128xf32>
    %216 = vector.extract_strided_slice %196 {offsets = [0, 256], sizes = [8, 128], strides = [1, 1]} : vector<8x384xf32> to vector<8x128xf32>
    %217 = vector.extract_strided_slice %199 {offsets = [0, 256], sizes = [8, 128], strides = [1, 1]} : vector<8x384xf32> to vector<8x128xf32>
    %218 = arith.mulf %207, %217 : vector<8x128xf32>
    %219 = arith.addf %216, %218 : vector<8x128xf32>
    %220 = math.tanh %219 : vector<8x128xf32>
    %cst_39 = arith.constant 1.000000e+00 : f32
    %221 = vector.broadcast %cst_39 : f32 to vector<8x128xf32>
    %222 = arith.subf %221, %215 : vector<8x128xf32>
    %223 = arith.mulf %222, %220 : vector<8x128xf32>
    %224 = arith.mulf %215, %195 : vector<8x128xf32>
    %225 = arith.addf %223, %224 : vector<8x128xf32>
    %226 = vector.extract_strided_slice %12 {offsets = [56, 0], sizes = [8, 384], strides = [1, 1]} : vector<64x384xf32> to vector<8x384xf32>
    %cst_40 = arith.constant dense<0.000000e+00> : vector<8x384xf32>
    %227 = tpu.matmul %225, %13, %cst_40 {dimension_numbers = #tpu.dot_dimension_numbers<[1], [0], [0], [1], [0, 0, 1, 1], [], []>} : vector<8x128xf32>, vector<128x384xf32>, vector<8x384xf32> -> vector<8x384xf32>
    %228 = vector.broadcast %14 : vector<1x384xf32> to vector<8x384xf32>
    %229 = arith.addf %227, %228 : vector<8x384xf32>
    %230 = vector.extract_strided_slice %226 {offsets = [0, 0], sizes = [8, 128], strides = [1, 1]} : vector<8x384xf32> to vector<8x128xf32>
    %231 = vector.extract_strided_slice %229 {offsets = [0, 0], sizes = [8, 128], strides = [1, 1]} : vector<8x384xf32> to vector<8x128xf32>
    %232 = arith.addf %230, %231 : vector<8x128xf32>
    %233 = arith.negf %232 : vector<8x128xf32>
    %234 = math.exp %233 : vector<8x128xf32>
    %cst_41 = arith.constant 1.000000e+00 : f32
    %235 = vector.broadcast %cst_41 : f32 to vector<8x128xf32>
    %236 = arith.addf %235, %234 : vector<8x128xf32>
    %237 = arith.divf %235, %236 : vector<8x128xf32>
    %238 = vector.extract_strided_slice %226 {offsets = [0, 128], sizes = [8, 128], strides = [1, 1]} : vector<8x384xf32> to vector<8x128xf32>
    %239 = vector.extract_strided_slice %229 {offsets = [0, 128], sizes = [8, 128], strides = [1, 1]} : vector<8x384xf32> to vector<8x128xf32>
    %240 = arith.addf %238, %239 : vector<8x128xf32>
    %241 = arith.negf %240 : vector<8x128xf32>
    %242 = math.exp %241 : vector<8x128xf32>
    %cst_42 = arith.constant 1.000000e+00 : f32
    %243 = vector.broadcast %cst_42 : f32 to vector<8x128xf32>
    %244 = arith.addf %243, %242 : vector<8x128xf32>
    %245 = arith.divf %243, %244 : vector<8x128xf32>
    %246 = vector.extract_strided_slice %226 {offsets = [0, 256], sizes = [8, 128], strides = [1, 1]} : vector<8x384xf32> to vector<8x128xf32>
    %247 = vector.extract_strided_slice %229 {offsets = [0, 256], sizes = [8, 128], strides = [1, 1]} : vector<8x384xf32> to vector<8x128xf32>
    %248 = arith.mulf %237, %247 : vector<8x128xf32>
    %249 = arith.addf %246, %248 : vector<8x128xf32>
    %250 = math.tanh %249 : vector<8x128xf32>
    %cst_43 = arith.constant 1.000000e+00 : f32
    %251 = vector.broadcast %cst_43 : f32 to vector<8x128xf32>
    %252 = arith.subf %251, %245 : vector<8x128xf32>
    %253 = arith.mulf %252, %250 : vector<8x128xf32>
    %254 = arith.mulf %245, %225 : vector<8x128xf32>
    %255 = arith.addf %253, %254 : vector<8x128xf32>
    %256 = tpu.concatenate %45, %75, %105, %135, %165, %195, %225, %255 in 0 : vector<8x128xf32>, vector<8x128xf32>, vector<8x128xf32>, vector<8x128xf32>, vector<8x128xf32>, vector<8x128xf32>, vector<8x128xf32>, vector<8x128xf32> -> vector<64x128xf32>
    %c24 = arith.constant 24 : index
    %c0_44 = arith.constant 0 : index
    %257 = vector.load %arg2[%c24, %c0_44] : memref<360x128xf32, #tpu.memory_space<vmem>>, vector<64x64xf32>
    %cst_45 = arith.constant dense<0.000000e+00> : vector<64x128xf32>
    %258 = tpu.matmul %257, %256, %cst_45 {dimension_numbers = #tpu.dot_dimension_numbers<[1], [0], [0], [1], [0, 0, 1, 1], [], []>} : vector<64x64xf32>, vector<64x128xf32>, vector<64x128xf32> -> vector<64x128xf32>
    %c88 = arith.constant 88 : index
    %c0_46 = arith.constant 0 : index
    %259 = vector.load %arg2[%c88, %c0_46] : memref<360x128xf32, #tpu.memory_space<vmem>>, vector<128x128xf32>
    %cst_47 = arith.constant dense<0.000000e+00> : vector<64x128xf32>
    %260 = tpu.matmul %258, %259, %cst_47 {dimension_numbers = #tpu.dot_dimension_numbers<[1], [0], [0], [1], [0, 0, 1, 1], [], []>} : vector<64x128xf32>, vector<128x128xf32>, vector<64x128xf32> -> vector<64x128xf32>
    %c216 = arith.constant 216 : index
    %c0_48 = arith.constant 0 : index
    %261 = vector.load %arg2[%c216, %c0_48] : memref<360x128xf32, #tpu.memory_space<vmem>>, vector<1x128xf32>
    %262 = vector.broadcast %261 : vector<1x128xf32> to vector<64x128xf32>
    %263 = arith.addf %260, %262 : vector<64x128xf32>
    %cst_49 = arith.constant 0.000000e+00 : f32
    %264 = vector.broadcast %cst_49 : f32 to vector<64x128xf32>
    %265 = arith.maximumf %263, %264 : vector<64x128xf32>
    %c224 = arith.constant 224 : index
    %c0_50 = arith.constant 0 : index
    %266 = vector.load %arg2[%c224, %c0_50] : memref<360x128xf32, #tpu.memory_space<vmem>>, vector<128x128xf32>
    %cst_51 = arith.constant dense<0.000000e+00> : vector<64x128xf32>
    %267 = tpu.matmul %265, %266, %cst_51 {dimension_numbers = #tpu.dot_dimension_numbers<[1], [0], [0], [1], [0, 0, 1, 1], [], []>} : vector<64x128xf32>, vector<128x128xf32>, vector<64x128xf32> -> vector<64x128xf32>
    %c352 = arith.constant 352 : index
    %c0_52 = arith.constant 0 : index
    %268 = vector.load %arg2[%c352, %c0_52] : memref<360x128xf32, #tpu.memory_space<vmem>>, vector<1x128xf32>
    %269 = vector.broadcast %268 : vector<1x128xf32> to vector<64x128xf32>
    %270 = arith.addf %267, %269 : vector<64x128xf32>
    %c0_53 = arith.constant 0 : index
    %c0_54 = arith.constant 0 : index
    %271 = vector.load %arg3[%c0_53, %c0_54] : memref<64x128xf32, #tpu.memory_space<vmem>>, vector<64x128xf32>
    tpu.vector_store %arg3[%c0_53, %c0_54], %270 {strides = array<i32>} : memref<64x128xf32, #tpu.memory_space<vmem>>, vector<64x128xf32>,
    return
  }
}

</mosaic_0001>

<bundles_post_ra>
// kernel: forward.1
= control target key start
LH: loop header
LB: loop body
LE: loop exit
PB: predicated region body
PF: predicated region fallthrough
CT: control target
= control target key end

     0   :  { %8 = vsyncpa [#allocation3], 0  ;;  %s4334_s0 = inlined_call_operand.vmem [shape: f32[64,16], index: 0, kind: input, shape index: {}]   ;;  %s4335_s1 = inlined_call_operand.hbm [shape: f32[272,384], index: 1, kind: input, shape index: {}]   ;;  %s4336_s2 = inlined_call_operand.hbm [shape: f32[360,128], index: 2, kind: input, shape index: {}]   ;;  %s4337_s3 = inlined_call_operand.vmem [shape: f32[64,128], index: 3, kind: output, shape index: {}]  }
   0x1   :  { %9 = vsyncpa [#allocation5], 0  ;;  %s3759_s12 = smov [#allocation2]   ;;  %s3711_s16 = scalar_lea.hbm %s4335_s1, 13056 }
   0x2   :  { %s17_s13 = sshll.u32 %s3759_s12, 4  ;;  %p3712_p0 = scmp.ne.s32.totalorder %s4335_s1, %s3711_s16  ;;  %s18_s13 = int_to_ptr.vmem [resolvable:$true] %s17_s13 }
   0x3   :  { %p3715_p1 = scmp.lt.u32.totalorder %s3711_s16, %s4335_s1 }
   0x5   :  { %p3717_p2 = pnand %p3715_p1, %p3712_p0 }
   0x7   :  { %3720 = shalt.err (!%p3717_p2)
}
   0x8   :  { %s3721_s21 = scalar_lea.vmem %s18_s13, 13056  ;;  %p3726_p4 = scmp.lt.s32.totalorder %s18_s13, %s18_s13 }
   0x9   :  { %p3722_p3 = scmp.ne.s32.totalorder %s18_s13, %s3721_s21  ;;  %p3727_p5 = scmp.lt.s32.totalorder %s3721_s21, %s3721_s21 }
   0xb   :  { %p3728_p6 = por %p3727_p5, %p3726_p4 }
   0xd   :  { %p3729_p7 = pnand %p3728_p6, %p3722_p3 }
   0xf   :  { %3732 = shalt.err (!%p3729_p7)
}
  0x10   :  { %s3760_s22 = smov 384   ;;  %s3761_s23 = smov 24  }
  0x11   :  { %23 = dma.hbm_to_vmem [thread:$0]  %s4335_s1, 13056, %s18_s13, [#allocation3], %s3760_s22, %s3760_s22, %s3761_s23  }
  0x12   :  { %s3762_s26 = smov [#allocation4]   ;;  %s3733_s30 = scalar_lea.hbm %s4336_s2, 5760 }
  0x13   :  { %s29_s27 = sshll.u32 %s3762_s26, 4  ;;  %p3734_p8 = scmp.ne.s32.totalorder %s4336_s2, %s3733_s30  ;;  %s30_s27 = int_to_ptr.vmem [resolvable:$true] %s29_s27 }
  0x14   :  { %p3737_p9 = scmp.lt.u32.totalorder %s3733_s30, %s4336_s2 }
  0x16   :  { %p3739_p10 = pnand %p3737_p9, %p3734_p8 }
  0x18   :  { %3742 = shalt.err (!%p3739_p10)
}
  0x19   :  { %s3743_s8 = scalar_lea.vmem %s30_s27, 5760  ;;  %p3748_p12 = scmp.lt.s32.totalorder %s30_s27, %s30_s27 }
  0x1a   :  { %p3744_p11 = scmp.ne.s32.totalorder %s30_s27, %s3743_s8  ;;  %p3749_p13 = scmp.lt.s32.totalorder %s3743_s8, %s3743_s8 }
  0x1c   :  { %p3750_p0 = por %p3749_p13, %p3748_p12 }
  0x1e   :  { %p3751_p1 = pnand %p3750_p0, %p3744_p11 }
  0x20   :  { %3754 = shalt.err (!%p3751_p1)
}
  0x21   :  { %s3763_s1 = smov 128   ;;  %s3764_s9 = smov 8  }
  0x22   :  { %35 = dma.hbm_to_vmem [thread:$0]  %s4336_s2, 5760, %s30_s27, [#allocation5], %s3763_s1, %s3763_s1, %s3764_s9  }
  0x23   :  { %3755 = dma.done.wait [#allocation3], 13056  }
  0x24   :  { %3756 = vsyncadd [#allocation3], 4294954240 }
  0x25   :  { %3757 = dma.done.wait [#allocation5], 5760  }
  0x26   :  { %3758 = vsyncadd [#allocation5], 4294961536  ;;  %vm57_vm0 = vcmask 130048   ;;  %v50_v0 = vld [vmem:[#allocation4] sm:$0xff]  ;;  %v51_v1 = vld [vmem:[#allocation4 + $0x8] sm:$0xff]  ;;  %vm3767_vm1 = vmmov 0  }
  0x27   :  { %v42_v2 = vld [vmem:[%s4334_s0] sm:$0xff]  ;;  %v2978_v3 = vpack.c.bf16 %v51_v1, %v50_v0  ;;  %v43_v4 = vld [vmem:[%s4334_s0 + $0x8] sm:$0xff]  ;;  %v44_v5 = vld [vmem:[%s4334_s0 + $0x10] sm:$0xff]  ;;  %vm1849_vm2 = vcmask 523264  }
  0x28   :  { %2526 = vmatprep.mubr.msk.f32.mxu0 %vm57_vm0, %v42_v2  ;;  %v196_v6 = vld [vmem:[#allocation2 + $0x8] sm:$0xff]  ;;  %v199_v7 = vld [vmem:[#allocation2 + $0x20] sm:$0xff]  ;;  %v198_v10 = vld [vmem:[#allocation2 + $0x18] sm:$0xff] }
  0x29   :  { %2979 = vmatprep.subr.bf16.mxu0 %v2978_v3  ;;  %v2982_v8 = vpack.c.bf16 %v199_v7, %v196_v6  ;;  %v195_v9 = vld [vmem:[#allocation2] sm:$0xff]  ;;  %v197_v11 = vld [vmem:[#allocation2 + $0x10] sm:$0xff]  ;;  %v200_v13 = vld [vmem:[#allocation2 + $0x28] sm:$0xff] }
  0x2a   :  { %2981 = vmatpush3.bf16.msra.mxu0 %v2978_v3  ;;  %v2984_v12 = vpack.c.bf16 %v198_v10, %v195_v9  ;;  %v202_v14 = vld [vmem:[#allocation2 + $0x38] sm:$0xff]  ;;  %v205_v15 = vld [vmem:[#allocation2 + $0x50] sm:$0xff]  ;;  %v3014_v17 = vpack.c.bf16 %v200_v13, %v197_v11  ;;  %v204_v20 = vld [vmem:[#allocation2 + $0x48] sm:$0xff] }
  0x2b   :  { %v45_v16 = vld [vmem:[%s4334_s0 + $0x18] sm:$0xff]  ;;  %2983 = vmatprep.subr.bf16.mxu1 %v2982_v8  ;;  %v2986_v18 = vpack.c.bf16 %v205_v15, %v202_v14  ;;  %v201_v19 = vld [vmem:[#allocation2 + $0x30] sm:$0xff]  ;;  %v203_v21 = vld [vmem:[#allocation2 + $0x40] sm:$0xff] }
  0x2c   :  { %v46_v22 = vld [vmem:[%s4334_s0 + $0x20] sm:$0xff]  ;;  %2985 = vmatpush1.bf16.msra.mxu1 %v2984_v12  ;;  %v2988_v23 = vpack.c.bf16 %v204_v20, %v201_v19  ;;  %v206_v24 = vld [vmem:[#allocation2 + $0x58] sm:$0xff]  ;;  %v208_v25 = vld [vmem:[#allocation2 + $0x68] sm:$0xff]  ;;  %3015 = vmatprep.subr.bf16.mxu0 %v3014_v17 }
  0x2d   :  { %2527 = vmatmul.mubr.msk.f32.vlgmr.msra.gmra.mrb[0].mxu0 %vm57_vm0, %v43_v4  ;;  %v211_v26 = vld [vmem:[#allocation2 + $0x80] sm:$0xff]  ;;  %v3018_v27 = vpack.c.bf16 %v206_v24, %v203_v21  ;;  %v210_v30 = vld [vmem:[#allocation2 + $0x78] sm:$0xff]  ;;  %v209_v31 = vld [vmem:[#allocation2 + $0x70] sm:$0xff]  ;;  %2987 = vmatprep.subr.bf16.mxu1 %v2986_v18 }
  0x2e   :  { %2529 = vmatprep.mubr.msk.f32.mxu0 %vm57_vm0, %v44_v5  ;;  %v2990_v28 = vpack.c.bf16 %v211_v26, %v208_v25  ;;  %v207_v29 = vld [vmem:[#allocation2 + $0x60] sm:$0xff]  ;;  %3017 = vmatpush3.bf16.msra.mxu0 %v3014_v17  ;;  %v212_v32 = vld [vmem:[#allocation2 + $0x88] sm:$0xff]  ;;  %v214_v33 = vld [vmem:[#allocation2 + $0x98] sm:$0xff] }
  0x2f   :  { %v217_v34 = vld [vmem:[#allocation2 + $0xb0] sm:$0xff]  ;;  %3019 = vmatprep.subr.bf16.mxu0 %v3018_v27  ;;  %v3022_v35 = vpack.c.bf16 %v212_v32, %v209_v31  ;;  %v2992_v36 = vpack.c.bf16 %v210_v30, %v207_v29  ;;  %v215_v37 = vld [vmem:[#allocation2 + $0xa0] sm:$0xff]  ;;  %v218_v38 = vld [vmem:[#allocation2 + $0xb8] sm:$0xff] }
  0x30   :  { %2989 = vmatpush1.bf16.msra.mxu1 %v2988_v23  ;;  %v47_v39 = vld [vmem:[%s4334_s0 + $0x28] sm:$0xff]  ;;  %v2994_v40 = vpack.c.bf16 %v217_v34, %v214_v33  ;;  %v213_v41 = vld [vmem:[#allocation2 + $0x90] sm:$0xff]  ;;  %v223_v45 = vld [vmem:[#allocation2 + $0xe0] sm:$0xff]  ;;  %v3026_v46 = vpack.c.bf16 %v218_v38, %v215_v37  ;;  %v3766_v23 = vmov 0.0|0.0  }
  0x31   :  { %2530 = vmatmul.mubr.msk.f32.gmra.mrb[2].mxu0 %vm57_vm0, %v45_v16  ;;  %2991 = vmatprep.subr.bf16.mxu1 %v2990_v28  ;;  %v216_v42 = vld [vmem:[#allocation2 + $0xa8] sm:$0xff]  ;;  %v48_v43 = vld [vmem:[%s4334_s0 + $0x30] sm:$0xff]  ;;  %v49_v50 = vld [vmem:[%s4334_s0 + $0x38] sm:$0xff] }
  0x32   :  { %2532 = vmatprep.mubr.msk.f32.mxu0 %vm57_vm0, %v46_v22  ;;  %3021 = vmatpush3.bf16.msra.mxu0 %v3018_v27  ;;  %v220_v44 = vld [vmem:[#allocation2 + $0xc8] sm:$0xff]  ;;  %v2996_v47 = vpack.c.bf16 %v216_v42, %v213_v41  ;;  %v221_v48 = vld [vmem:[#allocation2 + $0xd0] sm:$0xff]  ;;  %v219_v52 = vld [vmem:[#allocation2 + $0xc0] sm:$0xff]  ;;  %v3765_v22 = vmov 0.0  }
  0x33   :  { %3023 = vmatprep.subr.bf16.mxu0 %v3022_v35  ;;  %v224_v49 = vld [vmem:[#allocation2 + $0xe8] sm:$0xff]  ;;  %v2998_v51 = vpack.c.bf16 %v223_v45, %v220_v44  ;;  %v222_v53 = vld [vmem:[#allocation2 + $0xd8] sm:$0xff]  ;;  %v229_v55 = vld [vmem:[#allocation2 + $0x110] sm:$0xff]  ;;  %325 = vmatprep.mubr.f32.mxu1 %v3765_v22 }
  0x34   :  { %2993 = vmatpush1.bf16.msra.mxu1 %v2992_v36  ;;  %v226_v54 = vld [vmem:[#allocation2 + $0xf8] sm:$0xff]  ;;  %v3030_v56 = vpack.c.bf16 %v224_v49, %v221_v48  ;;  %v3000_v57 = vpack.c.bf16 %v222_v53, %v219_v52  ;;  %v227_v58 = vld [vmem:[#allocation2 + $0x100] sm:$0xff]  ;;  %v225_v61 = vld [vmem:[#allocation2 + $0xf0] sm:$0xff] }
  0x35   :  { %2533 = vmatmul.mubr.msk.f32.gmra.mrb[4].mxu0 %vm57_vm0, %v47_v39  ;;  %2995 = vmatprep.subr.bf16.mxu1 %v2994_v40  ;;  %v230_v59 = vld [vmem:[#allocation2 + $0x118] sm:$0xff]  ;;  %v3002_v60 = vpack.c.bf16 %v229_v55, %v226_v54  ;;  %v228_v62 = vld [vmem:[#allocation2 + $0x108] sm:$0xff]  ;;  %v235_v0 = vld [vmem:[#allocation2 + $0x140] sm:$0xff] }
  0x36   :  { %2535 = vmatprep.mubr.msk.f32.mxu0 %vm57_vm0, %v48_v43  ;;  %3025 = vmatpush3.bf16.msra.mxu0 %v3022_v35  ;;  %v232_v63 = vld [vmem:[#allocation2 + $0x128] sm:$0xff]  ;;  %v3034_v1 = vpack.c.bf16 %v230_v59, %v227_v58  ;;  %v3004_v2 = vpack.c.bf16 %v228_v62, %v225_v61  ;;  %v233_v3 = vld [vmem:[#allocation2 + $0x130] sm:$0xff]  ;;  %v231_v6 = vld [vmem:[#allocation2 + $0x120] sm:$0xff] }
  0x37   :  { %3027 = vmatprep.subr.bf16.mxu0 %v3026_v46  ;;  %v236_v4 = vld [vmem:[#allocation2 + $0x148] sm:$0xff]  ;;  %v3006_v5 = vpack.c.bf16 %v235_v0, %v232_v63  ;;  %v234_v7 = vld [vmem:[#allocation2 + $0x138] sm:$0xff]  ;;  %v241_v11 = vld [vmem:[#allocation2 + $0x170] sm:$0xff] }
  0x38   :  { %2997 = vmatpush1.bf16.msra.mxu1 %v2996_v47  ;;  %v3038_v8 = vpack.c.bf16 %v236_v4, %v233_v3  ;;  %v3008_v9 = vpack.c.bf16 %v234_v7, %v231_v6  ;;  %v238_v10 = vld [vmem:[#allocation2 + $0x158] sm:$0xff]  ;;  %v237_v13 = vld [vmem:[#allocation2 + $0x150] sm:$0xff]  ;;  %v240_v14 = vld [vmem:[#allocation2 + $0x168] sm:$0xff] }
  0x39   :  { %2536 = vmatmul.mubr.msk.f32.gmra.mrb[6].mxu0 %vm57_vm0, %v49_v50  ;;  %2999 = vmatprep.subr.bf16.mxu1 %v2998_v51  ;;  %v3010_v12 = vpack.c.bf16 %v241_v11, %v238_v10  ;;  %v3012_v15 = vpack.c.bf16 %v240_v14, %v237_v13  ;;  %v239_v16 = vld [vmem:[#allocation2 + $0x160] sm:$0xff]  ;;  %v242_v17 = vld [vmem:[#allocation2 + $0x178] sm:$0xff]  ;;  %v480_v19 = vld [vmem:[#allocation2 + $0x188] sm:$0xff] }
  0x3a   :  { %3029 = vmatpush3.bf16.msra.mxu0 %v3026_v46  ;;  %v3042_v18 = vpack.c.bf16 %v242_v17, %v239_v16  ;;  %v483_v20 = vld [vmem:[#allocation2 + $0x1a0] sm:$0xff]  ;;  %v482_v27 = vld [vmem:[#allocation2 + $0x198] sm:$0xff]  ;;  %v489_v31 = vld [vmem:[#allocation2 + $0x1d0] sm:$0xff] }
  0x3b   :  { %3031 = vmatprep.subr.bf16.mxu0 %v3030_v56  ;;  %v3844_v21 = vpack.c.bf16 %v483_v20, %v480_v19  ;;  %v3849_v24 = vld [vmem:[#allocation4 + $0x10] ss:$0 sm:$0xff]  ;;  %v486_v30 = vld [vmem:[#allocation2 + $0x1b8] sm:$0xff]  ;;  %v481_v33 = vld [vmem:[#allocation2 + $0x190] sm:$0xff] }
  0x3c   :  { %3001 = vmatpush1.bf16.msra.mxu1 %v3000_v57  ;;  %v479_v26 = vld [vmem:[#allocation2 + $0x180] sm:$0xff]  ;;  %v484_v34 = vld [vmem:[#allocation2 + $0x1a8] sm:$0xff]  ;;  %v3855_v38 = vpack.c.bf16 %v489_v31, %v486_v30  ;;  %v485_v39 = vld [vmem:[#allocation2 + $0x1b0] sm:$0xff] }
  0x3d   :  { %3003 = vmatprep.subr.bf16.mxu1 %v3002_v60  ;;  %v3853_v35 = vpack.c.bf16 %v482_v27, %v479_v26  ;;  %v488_v40 = vld [vmem:[#allocation2 + $0x1c8] sm:$0xff]  ;;  %v495_v45 = vld [vmem:[#allocation2 + $0x200] sm:$0xff]  ;;  %v3860_v46 = vpack.c.bf16 %v484_v34, %v481_v33  ;;  %v494_v54 = vld [vmem:[#allocation2 + $0x1f8] sm:$0xff] }
  0x3e   :  { %3033 = vmatpush3.bf16.msra.mxu0 %v3030_v56  ;;  %v492_v44 = vld [vmem:[#allocation2 + $0x1e8] sm:$0xff]  ;;  %v3865_v49 = vpack.c.bf16 %v488_v40, %v485_v39  ;;  %v491_v53 = vld [vmem:[#allocation2 + $0x1e0] sm:$0xff]  ;;  %v498_v57 = vld [vmem:[#allocation2 + $0x218] sm:$0xff] }
  0x3f   :  { %3035 = vmatprep.subr.bf16.mxu0 %v3034_v1  ;;  %v3869_v52 = vpack.c.bf16 %v495_v45, %v492_v44  ;;  %v501_v58 = vld [vmem:[#allocation2 + $0x230] sm:$0xff]  ;;  %v487_v60 = vld [vmem:[#allocation2 + $0x1c0] sm:$0xff]  ;;  %v490_v61 = vld [vmem:[#allocation2 + $0x1d8] sm:$0xff]  ;;  %v3877_v62 = vpack.c.bf16 %v494_v54, %v491_v53 }
  0x40   :  { %3005 = vmatpush1.bf16.msra.mxu1 %v3004_v2  ;;  %v497_v2 = vld [vmem:[#allocation2 + $0x210] sm:$0xff]  ;;  %v500_v3 = vld [vmem:[#allocation2 + $0x228] sm:$0xff]  ;;  %v507_v7 = vld [vmem:[#allocation2 + $0x260] sm:$0xff] }
  0x41   :  { %3007 = vmatprep.subr.bf16.mxu1 %v3006_v5  ;;  %v504_v6 = vld [vmem:[#allocation2 + $0x248] sm:$0xff]  ;;  %v3893_v11 = vpack.c.bf16 %v500_v3, %v497_v2  ;;  %v503_v17 = vld [vmem:[#allocation2 + $0x240] sm:$0xff]  ;;  %v510_v19 = vld [vmem:[#allocation2 + $0x278] sm:$0xff] }
  0x42   :  { %3037 = vmatpush3.bf16.msra.mxu0 %v3034_v1  ;;  %v3882_v1 = vpack.c.bf16 %v501_v58, %v498_v57  ;;  %v496_v13 = vld [vmem:[#allocation2 + $0x208] sm:$0xff]  ;;  %v513_v20 = vld [vmem:[#allocation2 + $0x290] sm:$0xff]  ;;  %v499_v26 = vld [vmem:[#allocation2 + $0x220] sm:$0xff] }
  0x43   :  { %3039 = vmatprep.subr.bf16.mxu0 %v3038_v8  ;;  %v502_v27 = vld [vmem:[#allocation2 + $0x238] sm:$0xff]  ;;  %v512_v30 = vld [vmem:[#allocation2 + $0x288] sm:$0xff]  ;;  %v515_v40 = vld [vmem:[#allocation2 + $0x2a0] sm:$0xff] }
  0x44   :  { %3009 = vmatpush1.bf16.msra.mxu1 %v3008_v9  ;;  %v3888_v9 = vpack.c.bf16 %v490_v61, %v487_v60  ;;  %v516_v31 = vld [vmem:[#allocation2 + $0x2a8] sm:$0xff]  ;;  %v3917_v33 = vpack.c.bf16 %v502_v27, %v499_v26  ;;  %v526_v60 = vld [vmem:[#allocation2 + $0x2f8] sm:$0xff] }
  0x45   :  { %3011 = vmatprep.subr.bf16.mxu1 %v3010_v12  ;;  %v493_v12 = vld [vmem:[#allocation2 + $0x1f0] sm:$0xff]  ;;  %v524_v53 = vld [vmem:[#allocation2 + $0x2e8] sm:$0xff] }
  0x46   :  { %3041 = vmatpush3.bf16.msra.mxu0 %v3038_v8  ;;  %v520_v57 = vld [vmem:[#allocation2 + $0x2c8] sm:$0xff] }
  0x47   :  { %3043 = vmatprep.subr.bf16.mxu0 %v3042_v18  ;;  %v244_v3 = vld [vmem:[#allocation2 + $0x300] ss:$8 sm:$0x7] }
  0x48   :  { %3013 = vmatpush1.bf16.msra.mxu1 %v3012_v15  ;;  %v3899_v15 = vpack.c.bf16 %v507_v7, %v504_v6 }
  0x49   :  { %3047 = vmatprep.subr.bf16.mxu1 %v3844_v21 }
  0x4a   :  { %3045 = vmatpush3.bf16.msra.mxu0 %v3042_v18  ;;  %v506_v18 = vld [vmem:[#allocation2 + $0x258] sm:$0xff] }
  0x4b   :  { %3078 = vmatprep.subr.bf16.mxu0 %v3766_v23 }
 0x100   :  { %v2528_v25 = vpop.f32.mrb[0].mxu0 }
 0x101   :  { %v154_v28 = vadd.f32 %v2528_v25, %v3849_v24  ;;  %v148_v29 = vpop.f32.mrb[1].mxu0  ;;  %v3906_v25 = vpack.c.bf16 %v506_v18, %v503_v17 }
 0x102   :  { %v149_v32 = vadd.f32 %v3849_v24, %v148_v29  ;;  %v509_v29 = vld [vmem:[#allocation2 + $0x270] sm:$0xff] }
 0x103   :  { %v188_v41 = vmax.f32 %v154_v28, 0.0  ;;  %v3909_v28 = vpack.c.bf16 %v513_v20, %v510_v19  ;;  %v3921_v34 = vpack.c.bf16 %v512_v30, %v509_v29  ;;  %v528_v30 = vld [vmem:[#allocation2 + $0x318] ss:$8 sm:$0x7] }
 0x104   :  { %v187_v36 = vmax.f32 %v149_v32, 0.0  ;;  %v2531_v37 = vpop.f32.mrb[2].mxu0  ;;  %v519_v32 = vld [vmem:[#allocation2 + $0x2c0] sm:$0xff] }
 0x105   :  { %v3858_v42 = vadd.f32 %v2531_v37, %v3849_v24  ;;  %v158_v43 = vpop.f32.mrb[3].mxu0  ;;  %v508_v37 = vld [vmem:[#allocation2 + $0x268] sm:$0xff]  ;;  %v3924_v39 = vpack.c.bf16 %v519_v32, %v516_v31 }
 0x106   :  { %v159_v47 = vadd.f32 %v3849_v24, %v158_v43  ;;  %326 = vmatmul.mubr.f32.vlgmr.msra.gmra.mrb[0].mxu1 %v187_v36  ;;  %2570 = vmatprep.mubr.f32.mxu0 %v187_v36  ;;  %v505_v36 = vld [vmem:[#allocation2 + $0x250] sm:$0xff] }
 0x107   :  { %v190_v48 = vmax.f32 %v3858_v42, 0.0  ;;  %3049 = vmatpush1.bf16.msra.mxu1 %v3853_v35  ;;  %2571 = vmatmul.mubr.f32.vlgmr.msra.gmra.mrb[8].mxu0 %v188_v41  ;;  %v522_v42 = vld [vmem:[#allocation2 + $0x2d8] sm:$0xff]  ;;  %v525_v43 = vld [vmem:[#allocation2 + $0x2f0] sm:$0xff]  ;;  %v3930_v44 = vpack.c.bf16 %v508_v37, %v505_v36 }
 0x108   :  { %v189_v50 = vmax.f32 %v159_v47, 0.0  ;;  %331 = vmatprep.mubr.f32.mxu1 %v3765_v22  ;;  %3051 = vmatprep.subr.bf16.mxu1 %v3855_v38  ;;  %v2534_v51 = vpop.f32.mrb[4].mxu0  ;;  %v511_v47 = vld [vmem:[#allocation2 + $0x280] sm:$0xff] }
 0x109   :  { %v3872_v55 = vadd.f32 %v2534_v51, %v3849_v24  ;;  %v168_v56 = vpop.f32.mrb[5].mxu0  ;;  %3080 = vmatpush3.bf16.msra.mxu0 %v3860_v46  ;;  %v521_v51 = vld [vmem:[#allocation2 + $0x2d0] sm:$0xff] }
 0x10a   :  { %332 = vmatmul.mubr.f32.gmra.mrb[2].mxu1 %v188_v41  ;;  %2573 = vmatprep.mubr.f32.mxu0 %v189_v50  ;;  %v169_v59 = vadd.f32 %v3849_v24, %v168_v56  ;;  %v518_v41 = vld [vmem:[#allocation2 + $0x2b8] sm:$0xff]  ;;  %v517_v56 = vld [vmem:[#allocation2 + $0x2b0] sm:$0xff] }
 0x10b   :  { %3053 = vmatpush1.bf16.msra.mxu1 %v3865_v49  ;;  %2574 = vmatmul.mubr.f32.gmra.mrb[10].mxu0 %v190_v48  ;;  %v192_v63 = vmax.f32 %v3872_v55, 0.0  ;;  %v3934_v45 = vpack.c.bf16 %v518_v41, %v515_v40  ;;  %v3945_v55 = vpack.c.bf16 %v524_v53, %v521_v51  ;;  %v3952_v58 = vpack.c.bf16 %v520_v57, %v517_v56 }
 0x10c   :  { %337 = vmatprep.mubr.f32.mxu1 %v3765_v22  ;;  %3055 = vmatprep.subr.bf16.mxu1 %v3869_v52  ;;  %v191_v0 = vmax.f32 %v169_v59, 0.0  ;;  %v2537_v4 = vpop.f32.mrb[6].mxu0  ;;  %v523_v59 = vld [vmem:[#allocation2 + $0x2e0] sm:$0xff] }
 0x10d   :  { %v3885_v5 = vadd.f32 %v2537_v4, %v3849_v24  ;;  %v178_v8 = vpop.f32.mrb[7].mxu0  ;;  %3081 = vmatprep.subr.bf16.mxu0 %v3766_v23  ;;  %v3960_v61 = vpack.c.bf16 %v526_v60, %v523_v59 }
 0x10e   :  { %338 = vmatmul.mubr.f32.gmra.mrb[4].mxu1 %v189_v50  ;;  %2576 = vmatprep.mubr.f32.mxu0 %v191_v0  ;;  %v179_v10 = vadd.f32 %v3849_v24, %v178_v8  ;;  %v3902_v24 = vpack.c.bf16 %v496_v13, %v493_v12  ;;  %v3937_v50 = vpack.c.bf16 %v525_v43, %v522_v42 }
 0x10f   :  { %3057 = vmatpush1.bf16.msra.mxu1 %v3877_v62  ;;  %343 = vmatprep.mubr.f32.mxu1 %v3765_v22  ;;  %v194_v14 = vmax.f32 %v3885_v5, 0.0 }
 0x110   :  { %3059 = vmatprep.subr.bf16.mxu1 %v3882_v1  ;;  %2577 = vmatmul.mubr.f32.gmra.mrb[12].mxu0 %v192_v63  ;;  %v193_v16 = vmax.f32 %v179_v10, 0.0 }
 0x111   :  { %3083 = vmatpush3.bf16.msra.mxu0 %v3888_v9 }
 0x112   :  { %344 = vmatmul.mubr.f32.gmra.mrb[6].mxu1 %v190_v48  ;;  %2579 = vmatprep.mubr.f32.mxu0 %v193_v16  ;;  %v514_v48 = vld [vmem:[#allocation2 + $0x298] sm:$0xff] }
 0x113   :  { %3061 = vmatpush1.bf16.msra.mxu1 %v3893_v11  ;;  %349 = vmatprep.mubr.f32.mxu1 %v3765_v22  ;;  %v3941_v54 = vpack.c.bf16 %v514_v48, %v511_v47 }
 0x114   :  { %3063 = vmatprep.subr.bf16.mxu1 %v3899_v15  ;;  %2580 = vmatmul.mubr.f32.gmra.mrb[14].mxu0 %v194_v14 }
 0x115   :  { %3084 = vmatprep.subr.bf16.mxu0 %v3766_v23  ;;  %2614 = vmatprep.mubr.msk.f32.mxu0 %vm3767_vm1, %v3765_v22 }
 0x116   :  { %350 = vmatmul.mubr.f32.gmra.mrb[8].mxu1 %v191_v0  ;;  %3086 = vmatpush3.bf16.msra.mxu0 %v3902_v24 }
 0x117   :  { %3065 = vmatpush1.bf16.msra.mxu1 %v3906_v25  ;;  %355 = vmatprep.mubr.f32.mxu1 %v3765_v22 }
 0x118   :  { %3067 = vmatprep.subr.bf16.mxu1 %v3909_v28  ;;  %3087 = vmatprep.subr.bf16.mxu0 %v3766_v23 }
 0x11a   :  { %356 = vmatmul.mubr.f32.gmra.mrb[10].mxu1 %v192_v63  ;;  %3089 = vmatpush3.bf16.msra.mxu0 %v3917_v33  ;;  %v246_v63 = vlaneseq }
 0x11b   :  { %3069 = vmatpush1.bf16.msra.mxu1 %v3921_v34  ;;  %361 = vmatprep.mubr.f32.mxu1 %v3765_v22 }
 0x11c   :  { %3071 = vmatprep.subr.bf16.mxu1 %v3924_v39  ;;  %3090 = vmatprep.subr.bf16.mxu0 %v3766_v23  ;;  %v247_v0 = vshrl.u32 %v246_v63, 7 }
 0x11e   :  { %362 = vmatmul.mubr.f32.gmra.mrb[12].mxu1 %v193_v16  ;;  %3092 = vmatpush3.bf16.msra.mxu0 %v3930_v44  ;;  %v256_v2 = vsub.s32 2, %v247_v0  ;;  %v248_v29 = vsub.s32 0, %v247_v0  ;;  %v252_v31 = vsub.s32 1, %v247_v0 }
 0x11f   :  { %3073 = vmatpush1.bf16.msra.mxu1 %v3934_v45  ;;  %367 = vmatprep.mubr.f32.mxu1 %v3765_v22 }
 0x120   :  { %3075 = vmatprep.subr.bf16.mxu1 %v3937_v50  ;;  %3093 = vmatprep.subr.bf16.mxu0 %v3766_v23  ;;  %v257_v4 = vrot.slane %v244_v3, %v256_v2  ;;  %v249_v32 = vrot.slane %v244_v3, %v248_v29  ;;  %v533_v36 = vrot.slane %v528_v30, %v248_v29 }
 0x121   :  { %v253_v37 = vrot.slane %v244_v3, %v252_v31  ;;  %v537_v40 = vrot.slane %v528_v30, %v252_v31  ;;  %v4021_v0 = vrot.slane %v528_v30, %v256_v2 }
 0x122   :  { %368 = vmatmul.mubr.f32.gmra.mrb[14].mxu1 %v194_v14  ;;  %3095 = vmatpush3.bf16.msra.mxu0 %v3941_v54  ;;  %v4015_v41 = vadd.f32 %v533_v36, %v249_v32 }
 0x123   :  { %3077 = vmatpush1.bf16.msra.mxu1 %v3945_v55  ;;  %609 = vmatprep.mubr.f32.mxu1 %v3765_v22  ;;  %v4017_v43 = vadd.f32 %v537_v40, %v253_v37 }
 0x124   :  { %3096 = vmatprep.subr.bf16.mxu0 %v3766_v23  ;;  %3103 = vmatprep.subr.bf16.mxu1 %v3844_v21 }
 0x126   :  { %610 = vmatmul.mubr.f32.vlgmr.msra.gmra.mrb[0].mxu1 %v3765_v22  ;;  %3098 = vmatpush3.bf16.msra.mxu0 %v3952_v58 }
 0x127   :  { %3099 = vmatprep.subr.bf16.mxu0 %v3766_v23  ;;  %3105 = vmatpush1.bf16.msra.mxu1 %v3853_v35 }
 0x128   :  { %3107 = vmatprep.subr.bf16.mxu1 %v3855_v38  ;;  %771 = vmatprep.mubr.f32.mxu1 %v3765_v22 }
 0x12a   :  { %3101 = vmatpush3.bf16.msra.mxu0 %v3960_v61 }
 0x12b   :  { %3134 = vmatprep.subr.bf16.mxu0 %v3766_v23  ;;  %3109 = vmatpush1.bf16.msra.mxu1 %v3865_v49 }
 0x12c   :  { %3111 = vmatprep.subr.bf16.mxu1 %v3869_v52 }
 0x12d   :  { %2615 = vmatmul.mubr.f32.vlgmr.msra.gmra.mrb[16].mxu0 %v3765_v22 }
 0x12e   :  { %3136 = vmatpush3.bf16.msra.mxu0 %v3860_v46  ;;  %2649 = vmatprep.mubr.msk.f32.mxu0 %vm3767_vm1, %v3765_v22 }
 0x12f   :  { %3137 = vmatprep.subr.bf16.mxu0 %v3766_v23  ;;  %3113 = vmatpush1.bf16.msra.mxu1 %v3877_v62 }
 0x130   :  { %3115 = vmatprep.subr.bf16.mxu1 %v3882_v1 }
 0x132   :  { %3139 = vmatpush3.bf16.msra.mxu0 %v3888_v9 }
 0x133   :  { %3140 = vmatprep.subr.bf16.mxu0 %v3766_v23  ;;  %3117 = vmatpush1.bf16.msra.mxu1 %v3893_v11 }
 0x134   :  { %3119 = vmatprep.subr.bf16.mxu1 %v3899_v15 }
 0x136   :  { %3142 = vmatpush3.bf16.msra.mxu0 %v3902_v24 }
 0x137   :  { %3143 = vmatprep.subr.bf16.mxu0 %v3766_v23  ;;  %3121 = vmatpush1.bf16.msra.mxu1 %v3906_v25 }
 0x138   :  { %3123 = vmatprep.subr.bf16.mxu1 %v3909_v28 }
 0x13a   :  { %3145 = vmatpush3.bf16.msra.mxu0 %v3917_v33 }
 0x13b   :  { %3146 = vmatprep.subr.bf16.mxu0 %v3766_v23  ;;  %3125 = vmatpush1.bf16.msra.mxu1 %v3921_v34 }
 0x13c   :  { %3127 = vmatprep.subr.bf16.mxu1 %v3924_v39 }
 0x13e   :  { %3148 = vmatpush3.bf16.msra.mxu0 %v3930_v44 }
 0x13f   :  { %3149 = vmatprep.subr.bf16.mxu0 %v3766_v23  ;;  %3129 = vmatpush1.bf16.msra.mxu1 %v3934_v45 }
 0x140   :  { %3131 = vmatprep.subr.bf16.mxu1 %v3937_v50 }
 0x142   :  { %3151 = vmatpush3.bf16.msra.mxu0 %v3941_v54 }
 0x143   :  { %3152 = vmatprep.subr.bf16.mxu0 %v3766_v23  ;;  %3133 = vmatpush1.bf16.msra.mxu1 %v3945_v55 }
 0x144   :  { %3159 = vmatprep.subr.bf16.mxu1 %v3844_v21 }
 0x146   :  { %3154 = vmatpush3.bf16.msra.mxu0 %v3952_v58 }
 0x147   :  { %3155 = vmatprep.subr.bf16.mxu0 %v3766_v23 }
 0x14a   :  { %3157 = vmatpush3.bf16.msra.mxu0 %v3960_v61 }
 0x14b   :  { %3190 = vmatprep.subr.bf16.mxu0 %v3766_v23 }
 0x1da   :  { %v2572_v5 = vpop.f32.mrb[8].mxu0 }
 0x1db   :  { %v4001_v6 = vadd.f32 %v2572_v5, %v257_v4  ;;  %v440_v7 = vpop.f32.mrb[9].mxu0 }
 0x1de   :  { %v2575_v8 = vpop.f32.mrb[10].mxu0 }
 0x1df   :  { %v4003_v10 = vadd.f32 %v2575_v8, %v257_v4  ;;  %v450_v12 = vpop.f32.mrb[11].mxu0 }
 0x1e0   :  { %v4005_v13 = vadd.f32 %v450_v12, %v257_v4 }
 0x1e3   :  { %v2578_v14 = vpop.f32.mrb[12].mxu0 }
 0x1e4   :  { %v4007_v16 = vadd.f32 %v2578_v14, %v257_v4  ;;  %v460_v17 = vpop.f32.mrb[13].mxu0  ;;  %v441_v14 = vadd.f32 %v440_v7, %v257_v4 }
 0x1e5   :  { %v4009_v18 = vadd.f32 %v460_v17, %v257_v4 }
 0x1e7   :  { %v2581_v19 = vpop.f32.mrb[14].mxu0 }
 0x1e8   :  { %v4011_v20 = vadd.f32 %v2581_v19, %v257_v4  ;;  %v470_v26 = vpop.f32.mrb[15].mxu0 }
 0x1e9   :  { %v4013_v27 = vadd.f32 %v470_v26, %v257_v4 }
 0x1f9   :  { %v611_v42 = vpop.f32.mrb[0].mxu1 }
 0x1fa   :  { %v3575_v47 = vadd.f32 %v4015_v41, %v611_v42  ;;  %v613_v48 = vpop.f32.mrb[1].mxu1 }
 0x1fb   :  { %v3577_v53 = vadd.f32 %v4017_v43, %v613_v48 }
 0x1fc   :  { %v2262_v51 = vmul.f32 -1.442695, %v3575_v47 }
 0x1fd   :  { %v2263_v57 = vmul.f32 -1.442695, %v3577_v53 }
 0x1fe   :  { %3631 = vpow2.f32 %v2262_v51 }
 0x1ff   :  { %3633 = vpow2.f32 %v2263_v57 }
 0x200   :  { %v682_v56 = vpop.f32.mrb[16].mxu0 }
 0x201   :  { %v2616_v59 = vpop.f32.mrb[17].mxu0  ;;  %v683_v8 = vadd.f32 %v682_v56, %v4021_v0 }
 0x208   :  { %v3632_v60 = vpop.eup %3631 }
 0x209   :  { %v690_v63 = vadd.f32 1.0, %v3632_v60  ;;  %v3634_v3 = vpop.eup %3633 }
 0x20a   :  { %v697_v5 = vadd.f32 1.0, %v3634_v3 }
 0x20b   :  { %3635 = vrcp.f32 %v690_v63 }
 0x20c   :  { %3637 = vrcp.f32 %v697_v5 }
 0x215   :  { %v3636_v12 = vpop.eup %3635 }
 0x216   :  { %v700_v17 = vmul.f32 %v3636_v12, %v683_v8  ;;  %v3638_v26 = vpop.eup %3637 }
 0x217   :  { %v703_v29 = vsub.f32 1.0, %v3638_v26  ;;  %v705_v36 = vmul.f32 0.0, %v3638_v26 }
 0x218   :  { %v701_v19 = vadd.f32 %v700_v17, %v441_v14 }
 0x21a   :  { %3639 = vtanh.f32 %v701_v19 }
 0x224   :  { %v3640_v31 = vpop.eup %3639 }
 0x225   :  { %v704_v32 = vmul.f32 %v3640_v31, %v703_v29 }
 0x227   :  { %v4024_v37 = vadd.f32 %v705_v36, %v704_v32 }
 0x229   :  { %772 = vmatmul.mubr.f32.vlgmr.msra.gmra.mrb[2].mxu1 %v4024_v37  ;;  %2650 = vmatmul.mubr.f32.vlgmr.msra.gmra.mrb[18].mxu0 %v4024_v37 }
 0x22a   :  { %3161 = vmatpush1.bf16.msra.mxu1 %v3853_v35  ;;  %3192 = vmatpush3.bf16.msra.mxu0 %v3860_v46 }
 0x22b   :  { %3163 = vmatprep.subr.bf16.mxu1 %v3855_v38  ;;  %3193 = vmatprep.subr.bf16.mxu0 %v3766_v23 }
 0x22c   :  { %933 = vmatprep.mubr.f32.mxu1 %v3765_v22  ;;  %2684 = vmatprep.mubr.msk.f32.mxu0 %vm3767_vm1, %v3765_v22 }
 0x22e   :  { %3165 = vmatpush1.bf16.msra.mxu1 %v3865_v49  ;;  %3195 = vmatpush3.bf16.msra.mxu0 %v3888_v9 }
 0x22f   :  { %3167 = vmatprep.subr.bf16.mxu1 %v3869_v52  ;;  %3196 = vmatprep.subr.bf16.mxu0 %v3766_v23 }
 0x232   :  { %3169 = vmatpush1.bf16.msra.mxu1 %v3877_v62  ;;  %3198 = vmatpush3.bf16.msra.mxu0 %v3902_v24 }
 0x233   :  { %3171 = vmatprep.subr.bf16.mxu1 %v3882_v1  ;;  %3199 = vmatprep.subr.bf16.mxu0 %v3766_v23 }
 0x236   :  { %3173 = vmatpush1.bf16.msra.mxu1 %v3893_v11  ;;  %3201 = vmatpush3.bf16.msra.mxu0 %v3917_v33 }
 0x237   :  { %3175 = vmatprep.subr.bf16.mxu1 %v3899_v15  ;;  %3202 = vmatprep.subr.bf16.mxu0 %v3766_v23 }
 0x23a   :  { %3177 = vmatpush1.bf16.msra.mxu1 %v3906_v25  ;;  %3204 = vmatpush3.bf16.msra.mxu0 %v3930_v44 }
 0x23b   :  { %3179 = vmatprep.subr.bf16.mxu1 %v3909_v28  ;;  %3205 = vmatprep.subr.bf16.mxu0 %v3766_v23 }
 0x23e   :  { %3181 = vmatpush1.bf16.msra.mxu1 %v3921_v34  ;;  %3207 = vmatpush3.bf16.msra.mxu0 %v3941_v54 }
 0x23f   :  { %3183 = vmatprep.subr.bf16.mxu1 %v3924_v39  ;;  %3208 = vmatprep.subr.bf16.mxu0 %v3766_v23 }
 0x242   :  { %3185 = vmatpush1.bf16.msra.mxu1 %v3934_v45  ;;  %3210 = vmatpush3.bf16.msra.mxu0 %v3952_v58 }
 0x243   :  { %3187 = vmatprep.subr.bf16.mxu1 %v3937_v50  ;;  %3211 = vmatprep.subr.bf16.mxu0 %v3766_v23 }
 0x246   :  { %3189 = vmatpush1.bf16.msra.mxu1 %v3945_v55  ;;  %3213 = vmatpush3.bf16.msra.mxu0 %v3960_v61 }
 0x247   :  { %3215 = vmatprep.subr.bf16.mxu1 %v3844_v21  ;;  %3246 = vmatprep.subr.bf16.mxu0 %v3766_v23 }
 0x2fc   :  { %v773_v2 = vpop.f32.mrb[2].mxu1  ;;  %v844_v4 = vpop.f32.mrb[18].mxu0 }
 0x2fd   :  { %v3579_v7 = vadd.f32 %v4015_v41, %v773_v2  ;;  %v775_v30 = vpop.f32.mrb[3].mxu1  ;;  %v2651_v40 = vpop.f32.mrb[19].mxu0  ;;  %v845_v59 = vadd.f32 %v844_v4, %v4021_v0 }
 0x2fe   :  { %v3581_v47 = vadd.f32 %v4017_v43, %v775_v30 }
 0x2ff   :  { %v2264_v42 = vmul.f32 -1.442695, %v3579_v7 }
 0x300   :  { %v2265_v48 = vmul.f32 -1.442695, %v3581_v47 }
 0x301   :  { %3641 = vpow2.f32 %v2264_v42 }
 0x302   :  { %3643 = vpow2.f32 %v2265_v48 }
 0x30b   :  { %v3642_v51 = vpop.eup %3641 }
 0x30c   :  { %v852_v53 = vadd.f32 1.0, %v3642_v51  ;;  %v3644_v56 = vpop.eup %3643 }
 0x30d   :  { %v859_v57 = vadd.f32 1.0, %v3644_v56 }
 0x30e   :  { %3645 = vrcp.f32 %v852_v53 }
 0x30f   :  { %3647 = vrcp.f32 %v859_v57 }
 0x318   :  { %v3646_v60 = vpop.eup %3645 }
 0x319   :  { %v862_v63 = vmul.f32 %v3646_v60, %v845_v59  ;;  %v3648_v5 = vpop.eup %3647 }
 0x31a   :  { %v865_v8 = vsub.f32 1.0, %v3648_v5  ;;  %v867_v17 = vmul.f32 %v3648_v5, %v4024_v37 }
 0x31b   :  { %v863_v3 = vadd.f32 %v862_v63, %v4001_v6 }
 0x31d   :  { %3649 = vtanh.f32 %v863_v3 }
 0x327   :  { %v3650_v12 = vpop.eup %3649 }
 0x328   :  { %v866_v14 = vmul.f32 %v3650_v12, %v865_v8 }
 0x32a   :  { %v4068_v19 = vadd.f32 %v867_v17, %v866_v14 }
 0x32c   :  { %934 = vmatmul.mubr.f32.vlgmr.msra.gmra.mrb[4].mxu1 %v4068_v19  ;;  %2685 = vmatmul.mubr.f32.vlgmr.msra.gmra.mrb[20].mxu0 %v4068_v19 }
 0x32d   :  { %3217 = vmatpush1.bf16.msra.mxu1 %v3853_v35  ;;  %3248 = vmatpush3.bf16.msra.mxu0 %v3860_v46 }
 0x32e   :  { %3219 = vmatprep.subr.bf16.mxu1 %v3855_v38  ;;  %3249 = vmatprep.subr.bf16.mxu0 %v3766_v23 }
 0x32f   :  { %1095 = vmatprep.mubr.f32.mxu1 %v3765_v22  ;;  %2719 = vmatprep.mubr.msk.f32.mxu0 %vm3767_vm1, %v3765_v22 }
 0x331   :  { %3221 = vmatpush1.bf16.msra.mxu1 %v3865_v49  ;;  %3251 = vmatpush3.bf16.msra.mxu0 %v3888_v9 }
 0x332   :  { %3223 = vmatprep.subr.bf16.mxu1 %v3869_v52  ;;  %3252 = vmatprep.subr.bf16.mxu0 %v3766_v23 }
 0x335   :  { %3225 = vmatpush1.bf16.msra.mxu1 %v3877_v62  ;;  %3254 = vmatpush3.bf16.msra.mxu0 %v3902_v24 }
 0x336   :  { %3227 = vmatprep.subr.bf16.mxu1 %v3882_v1  ;;  %3255 = vmatprep.subr.bf16.mxu0 %v3766_v23 }
 0x339   :  { %3229 = vmatpush1.bf16.msra.mxu1 %v3893_v11  ;;  %3257 = vmatpush3.bf16.msra.mxu0 %v3917_v33 }
 0x33a   :  { %3231 = vmatprep.subr.bf16.mxu1 %v3899_v15  ;;  %3258 = vmatprep.subr.bf16.mxu0 %v3766_v23 }
 0x33d   :  { %3233 = vmatpush1.bf16.msra.mxu1 %v3906_v25  ;;  %3260 = vmatpush3.bf16.msra.mxu0 %v3930_v44 }
 0x33e   :  { %3235 = vmatprep.subr.bf16.mxu1 %v3909_v28  ;;  %3261 = vmatprep.subr.bf16.mxu0 %v3766_v23 }
 0x341   :  { %3237 = vmatpush1.bf16.msra.mxu1 %v3921_v34  ;;  %3263 = vmatpush3.bf16.msra.mxu0 %v3941_v54 }
 0x342   :  { %3239 = vmatprep.subr.bf16.mxu1 %v3924_v39  ;;  %3264 = vmatprep.subr.bf16.mxu0 %v3766_v23 }
 0x345   :  { %3241 = vmatpush1.bf16.msra.mxu1 %v3934_v45  ;;  %3266 = vmatpush3.bf16.msra.mxu0 %v3952_v58 }
 0x346   :  { %3243 = vmatprep.subr.bf16.mxu1 %v3937_v50  ;;  %3267 = vmatprep.subr.bf16.mxu0 %v3766_v23 }
 0x349   :  { %3245 = vmatpush1.bf16.msra.mxu1 %v3945_v55  ;;  %3269 = vmatpush3.bf16.msra.mxu0 %v3960_v61 }
 0x34a   :  { %3271 = vmatprep.subr.bf16.mxu1 %v3844_v21  ;;  %3302 = vmatprep.subr.bf16.mxu0 %v3766_v23 }
 0x3ff   :  { %v935_v6 = vpop.f32.mrb[4].mxu1  ;;  %v1006_v26 = vpop.f32.mrb[20].mxu0 }
 0x400   :  { %v3583_v29 = vadd.f32 %v4015_v41, %v935_v6  ;;  %v937_v31 = vpop.f32.mrb[5].mxu1  ;;  %v2686_v32 = vpop.f32.mrb[21].mxu0  ;;  %v1007_v47 = vadd.f32 %v1006_v26, %v4021_v0 }
 0x401   :  { %v3585_v2 = vadd.f32 %v4017_v43, %v937_v31 }
 0x402   :  { %v2266_v36 = vmul.f32 -1.442695, %v3583_v29 }
 0x403   :  { %v2267_v4 = vmul.f32 -1.442695, %v3585_v2 }
 0x404   :  { %3651 = vpow2.f32 %v2266_v36 }
 0x405   :  { %3653 = vpow2.f32 %v2267_v4 }
 0x40e   :  { %v3652_v7 = vpop.eup %3651 }
 0x40f   :  { %v1014_v30 = vadd.f32 1.0, %v3652_v7  ;;  %v3654_v40 = vpop.eup %3653 }
 0x410   :  { %v1021_v42 = vadd.f32 1.0, %v3654_v40 }
 0x411   :  { %3655 = vrcp.f32 %v1014_v30 }
 0x412   :  { %3657 = vrcp.f32 %v1021_v42 }
 0x41b   :  { %v3656_v48 = vpop.eup %3655 }
 0x41c   :  { %v1024_v51 = vmul.f32 %v3656_v48, %v1007_v47  ;;  %v3658_v56 = vpop.eup %3657 }
 0x41d   :  { %v1027_v57 = vsub.f32 1.0, %v3658_v56  ;;  %v1029_v63 = vmul.f32 %v3658_v56, %v4068_v19 }
 0x41e   :  { %v1025_v53 = vadd.f32 %v1024_v51, %v4005_v13 }
 0x420   :  { %3659 = vtanh.f32 %v1025_v53 }
 0x42a   :  { %v3660_v59 = vpop.eup %3659 }
 0x42b   :  { %v1028_v60 = vmul.f32 %v3660_v59, %v1027_v57 }
 0x42d   :  { %v4112_v3 = vadd.f32 %v1029_v63, %v1028_v60 }
 0x42f   :  { %1096 = vmatmul.mubr.f32.vlgmr.msra.gmra.mrb[6].mxu1 %v4112_v3  ;;  %2720 = vmatmul.mubr.f32.vlgmr.msra.gmra.mrb[22].mxu0 %v4112_v3 }
 0x430   :  { %3273 = vmatpush1.bf16.msra.mxu1 %v3853_v35  ;;  %3304 = vmatpush3.bf16.msra.mxu0 %v3860_v46 }
 0x431   :  { %3275 = vmatprep.subr.bf16.mxu1 %v3855_v38  ;;  %3305 = vmatprep.subr.bf16.mxu0 %v3766_v23 }
 0x432   :  { %1257 = vmatprep.mubr.f32.mxu1 %v3765_v22  ;;  %2754 = vmatprep.mubr.msk.f32.mxu0 %vm3767_vm1, %v3765_v22 }
 0x434   :  { %3277 = vmatpush1.bf16.msra.mxu1 %v3865_v49  ;;  %3307 = vmatpush3.bf16.msra.mxu0 %v3888_v9 }
 0x435   :  { %3279 = vmatprep.subr.bf16.mxu1 %v3869_v52  ;;  %3308 = vmatprep.subr.bf16.mxu0 %v3766_v23 }
 0x438   :  { %3281 = vmatpush1.bf16.msra.mxu1 %v3877_v62  ;;  %3310 = vmatpush3.bf16.msra.mxu0 %v3902_v24 }
 0x439   :  { %3283 = vmatprep.subr.bf16.mxu1 %v3882_v1  ;;  %3311 = vmatprep.subr.bf16.mxu0 %v3766_v23 }
 0x43c   :  { %3285 = vmatpush1.bf16.msra.mxu1 %v3893_v11  ;;  %3313 = vmatpush3.bf16.msra.mxu0 %v3917_v33 }
 0x43d   :  { %3287 = vmatprep.subr.bf16.mxu1 %v3899_v15  ;;  %3314 = vmatprep.subr.bf16.mxu0 %v3766_v23 }
 0x440   :  { %3289 = vmatpush1.bf16.msra.mxu1 %v3906_v25  ;;  %3316 = vmatpush3.bf16.msra.mxu0 %v3930_v44 }
 0x441   :  { %3291 = vmatprep.subr.bf16.mxu1 %v3909_v28  ;;  %3317 = vmatprep.subr.bf16.mxu0 %v3766_v23 }
 0x444   :  { %3293 = vmatpush1.bf16.msra.mxu1 %v3921_v34  ;;  %3319 = vmatpush3.bf16.msra.mxu0 %v3941_v54 }
 0x445   :  { %3295 = vmatprep.subr.bf16.mxu1 %v3924_v39  ;;  %3320 = vmatprep.subr.bf16.mxu0 %v3766_v23 }
 0x448   :  { %3297 = vmatpush1.bf16.msra.mxu1 %v3934_v45  ;;  %3322 = vmatpush3.bf16.msra.mxu0 %v3952_v58 }
 0x449   :  { %3299 = vmatprep.subr.bf16.mxu1 %v3937_v50  ;;  %3323 = vmatprep.subr.bf16.mxu0 %v3766_v23 }
 0x44c   :  { %3301 = vmatpush1.bf16.msra.mxu1 %v3945_v55  ;;  %3325 = vmatpush3.bf16.msra.mxu0 %v3960_v61 }
 0x44d   :  { %3327 = vmatprep.subr.bf16.mxu1 %v3844_v21  ;;  %3358 = vmatprep.subr.bf16.mxu0 %v3766_v23 }
 0x502   :  { %v1097_v13 = vpop.f32.mrb[6].mxu1  ;;  %v1168_v5 = vpop.f32.mrb[22].mxu0 }
 0x503   :  { %v3587_v8 = vadd.f32 %v4015_v41, %v1097_v13  ;;  %v1099_v12 = vpop.f32.mrb[7].mxu1  ;;  %v2721_v14 = vpop.f32.mrb[23].mxu0  ;;  %v1169_v2 = vadd.f32 %v1168_v5, %v4021_v0 }
 0x504   :  { %v3589_v6 = vadd.f32 %v4017_v43, %v1099_v12 }
 0x505   :  { %v2268_v17 = vmul.f32 -1.442695, %v3587_v8 }
 0x506   :  { %v2269_v26 = vmul.f32 -1.442695, %v3589_v6 }
 0x507   :  { %3661 = vpow2.f32 %v2268_v17 }
 0x508   :  { %3663 = vpow2.f32 %v2269_v26 }
 0x511   :  { %v3662_v29 = vpop.eup %3661 }
 0x512   :  { %v1176_v31 = vadd.f32 1.0, %v3662_v29  ;;  %v3664_v32 = vpop.eup %3663 }
 0x513   :  { %v1183_v36 = vadd.f32 1.0, %v3664_v32 }
 0x514   :  { %3665 = vrcp.f32 %v1176_v31 }
 0x515   :  { %3667 = vrcp.f32 %v1183_v36 }
 0x51e   :  { %v3666_v4 = vpop.eup %3665 }
 0x51f   :  { %v1186_v7 = vmul.f32 %v3666_v4, %v1169_v2  ;;  %v3668_v40 = vpop.eup %3667 }
 0x520   :  { %v1189_v42 = vsub.f32 1.0, %v3668_v40  ;;  %v1191_v51 = vmul.f32 %v3668_v40, %v4112_v3 }
 0x521   :  { %v1187_v30 = vadd.f32 %v1186_v7, %v4003_v10 }
 0x523   :  { %3669 = vtanh.f32 %v1187_v30 }
 0x52d   :  { %v3670_v47 = vpop.eup %3669 }
 0x52e   :  { %v1190_v48 = vmul.f32 %v3670_v47, %v1189_v42 }
 0x530   :  { %v4156_v53 = vadd.f32 %v1191_v51, %v1190_v48 }
 0x532   :  { %1258 = vmatmul.mubr.f32.vlgmr.msra.gmra.mrb[8].mxu1 %v4156_v53  ;;  %2755 = vmatmul.mubr.f32.vlgmr.msra.gmra.mrb[24].mxu0 %v4156_v53 }
 0x533   :  { %3329 = vmatpush1.bf16.msra.mxu1 %v3853_v35  ;;  %3360 = vmatpush3.bf16.msra.mxu0 %v3860_v46 }
 0x534   :  { %3331 = vmatprep.subr.bf16.mxu1 %v3855_v38  ;;  %3361 = vmatprep.subr.bf16.mxu0 %v3766_v23 }
 0x535   :  { %1419 = vmatprep.mubr.f32.mxu1 %v3765_v22  ;;  %2789 = vmatprep.mubr.msk.f32.mxu0 %vm3767_vm1, %v3765_v22 }
 0x537   :  { %3333 = vmatpush1.bf16.msra.mxu1 %v3865_v49  ;;  %3363 = vmatpush3.bf16.msra.mxu0 %v3888_v9 }
 0x538   :  { %3335 = vmatprep.subr.bf16.mxu1 %v3869_v52  ;;  %3364 = vmatprep.subr.bf16.mxu0 %v3766_v23 }
 0x53b   :  { %3337 = vmatpush1.bf16.msra.mxu1 %v3877_v62  ;;  %3366 = vmatpush3.bf16.msra.mxu0 %v3902_v24 }
 0x53c   :  { %3339 = vmatprep.subr.bf16.mxu1 %v3882_v1  ;;  %3367 = vmatprep.subr.bf16.mxu0 %v3766_v23 }
 0x53f   :  { %3341 = vmatpush1.bf16.msra.mxu1 %v3893_v11  ;;  %3369 = vmatpush3.bf16.msra.mxu0 %v3917_v33 }
 0x540   :  { %3343 = vmatprep.subr.bf16.mxu1 %v3899_v15  ;;  %3370 = vmatprep.subr.bf16.mxu0 %v3766_v23 }
 0x543   :  { %3345 = vmatpush1.bf16.msra.mxu1 %v3906_v25  ;;  %3372 = vmatpush3.bf16.msra.mxu0 %v3930_v44 }
 0x544   :  { %3347 = vmatprep.subr.bf16.mxu1 %v3909_v28  ;;  %3373 = vmatprep.subr.bf16.mxu0 %v3766_v23 }
 0x547   :  { %3349 = vmatpush1.bf16.msra.mxu1 %v3921_v34  ;;  %3375 = vmatpush3.bf16.msra.mxu0 %v3941_v54 }
 0x548   :  { %3351 = vmatprep.subr.bf16.mxu1 %v3924_v39  ;;  %3376 = vmatprep.subr.bf16.mxu0 %v3766_v23 }
 0x54b   :  { %3353 = vmatpush1.bf16.msra.mxu1 %v3934_v45  ;;  %3378 = vmatpush3.bf16.msra.mxu0 %v3952_v58 }
 0x54c   :  { %3355 = vmatprep.subr.bf16.mxu1 %v3937_v50  ;;  %3379 = vmatprep.subr.bf16.mxu0 %v3766_v23 }
 0x54f   :  { %3357 = vmatpush1.bf16.msra.mxu1 %v3945_v55  ;;  %3381 = vmatpush3.bf16.msra.mxu0 %v3960_v61 }
 0x550   :  { %3383 = vmatprep.subr.bf16.mxu1 %v3844_v21  ;;  %3414 = vmatprep.subr.bf16.mxu0 %v3766_v23 }
 0x605   :  { %v1259_v10 = vpop.f32.mrb[8].mxu1  ;;  %v1330_v56 = vpop.f32.mrb[24].mxu0 }
 0x606   :  { %v3591_v57 = vadd.f32 %v4015_v41, %v1259_v10  ;;  %v1261_v59 = vpop.f32.mrb[9].mxu1  ;;  %v2756_v60 = vpop.f32.mrb[25].mxu0  ;;  %v1331_v6 = vadd.f32 %v1330_v56, %v4021_v0 }
 0x607   :  { %v3593_v13 = vadd.f32 %v4017_v43, %v1261_v59 }
 0x608   :  { %v2270_v63 = vmul.f32 -1.442695, %v3591_v57 }
 0x609   :  { %v2271_v5 = vmul.f32 -1.442695, %v3593_v13 }
 0x60a   :  { %3671 = vpow2.f32 %v2270_v63 }
 0x60b   :  { %3673 = vpow2.f32 %v2271_v5 }
 0x614   :  { %v3672_v8 = vpop.eup %3671 }
 0x615   :  { %v1338_v12 = vadd.f32 1.0, %v3672_v8  ;;  %v3674_v14 = vpop.eup %3673 }
 0x616   :  { %v1345_v17 = vadd.f32 1.0, %v3674_v14 }
 0x617   :  { %3675 = vrcp.f32 %v1338_v12 }
 0x618   :  { %3677 = vrcp.f32 %v1345_v17 }
 0x621   :  { %v3676_v26 = vpop.eup %3675 }
 0x622   :  { %v1348_v29 = vmul.f32 %v3676_v26, %v1331_v6  ;;  %v3678_v32 = vpop.eup %3677 }
 0x623   :  { %v1351_v36 = vsub.f32 1.0, %v3678_v32  ;;  %v1353_v7 = vmul.f32 %v3678_v32, %v4156_v53  ;;  %v1982_v32 = vld [vmem:[#allocation4 + $0x70] sm:$0xff] }
 0x624   :  { %v1349_v31 = vadd.f32 %v1348_v29, %v4009_v18 }
 0x626   :  { %3679 = vtanh.f32 %v1349_v31 }
 0x630   :  { %v3680_v2 = vpop.eup %3679 }
 0x631   :  { %v1352_v4 = vmul.f32 %v3680_v2, %v1351_v36  ;;  %v1983_v2 = vld [vmem:[#allocation4 + $0x78] sm:$0xff] }
 0x633   :  { %v4200_v30 = vadd.f32 %v1353_v7, %v1352_v4  ;;  %v1985_v4 = vld [vmem:[#allocation4 + $0x88] sm:$0xff]  ;;  %v1986_v7 = vld [vmem:[#allocation4 + $0x90] sm:$0xff] }
 0x635   :  { %1420 = vmatmul.mubr.f32.vlgmr.msra.gmra.mrb[10].mxu1 %v4200_v30  ;;  %2790 = vmatmul.mubr.f32.vlgmr.msra.gmra.mrb[26].mxu0 %v4200_v30 }
 0x636   :  { %3385 = vmatpush1.bf16.msra.mxu1 %v3853_v35  ;;  %3416 = vmatpush3.bf16.msra.mxu0 %v3860_v46 }
 0x637   :  { %3387 = vmatprep.subr.bf16.mxu1 %v3855_v38  ;;  %3417 = vmatprep.subr.bf16.mxu0 %v3766_v23 }
 0x638   :  { %1581 = vmatprep.mubr.f32.mxu1 %v3765_v22  ;;  %2824 = vmatprep.mubr.msk.f32.mxu0 %vm3767_vm1, %v3765_v22 }
 0x63a   :  { %3389 = vmatpush1.bf16.msra.mxu1 %v3865_v49  ;;  %3419 = vmatpush3.bf16.msra.mxu0 %v3888_v9 }
 0x63b   :  { %3391 = vmatprep.subr.bf16.mxu1 %v3869_v52  ;;  %3420 = vmatprep.subr.bf16.mxu0 %v3766_v23 }
 0x63e   :  { %3393 = vmatpush1.bf16.msra.mxu1 %v3877_v62  ;;  %3422 = vmatpush3.bf16.msra.mxu0 %v3902_v24 }
 0x63f   :  { %3395 = vmatprep.subr.bf16.mxu1 %v3882_v1  ;;  %3423 = vmatprep.subr.bf16.mxu0 %v3766_v23 }
 0x642   :  { %3397 = vmatpush1.bf16.msra.mxu1 %v3893_v11  ;;  %3425 = vmatpush3.bf16.msra.mxu0 %v3917_v33 }
 0x643   :  { %3399 = vmatprep.subr.bf16.mxu1 %v3899_v15  ;;  %3426 = vmatprep.subr.bf16.mxu0 %v3766_v23 }
 0x646   :  { %3401 = vmatpush1.bf16.msra.mxu1 %v3906_v25  ;;  %3428 = vmatpush3.bf16.msra.mxu0 %v3930_v44 }
 0x647   :  { %3403 = vmatprep.subr.bf16.mxu1 %v3909_v28  ;;  %3429 = vmatprep.subr.bf16.mxu0 %v3766_v23 }
 0x64a   :  { %3405 = vmatpush1.bf16.msra.mxu1 %v3921_v34  ;;  %3431 = vmatpush3.bf16.msra.mxu0 %v3941_v54 }
 0x64b   :  { %3407 = vmatprep.subr.bf16.mxu1 %v3924_v39  ;;  %3432 = vmatprep.subr.bf16.mxu0 %v3766_v23 }
 0x64e   :  { %3409 = vmatpush1.bf16.msra.mxu1 %v3934_v45  ;;  %3434 = vmatpush3.bf16.msra.mxu0 %v3952_v58 }
 0x64f   :  { %3411 = vmatprep.subr.bf16.mxu1 %v3937_v50  ;;  %3435 = vmatprep.subr.bf16.mxu0 %v3766_v23 }
 0x652   :  { %3413 = vmatpush1.bf16.msra.mxu1 %v3945_v55  ;;  %3437 = vmatpush3.bf16.msra.mxu0 %v3960_v61 }
 0x653   :  { %3439 = vmatprep.subr.bf16.mxu1 %v3844_v21  ;;  %3470 = vmatprep.subr.bf16.mxu0 %v3766_v23 }
 0x708   :  { %v1421_v18 = vpop.f32.mrb[10].mxu1  ;;  %v1492_v40 = vpop.f32.mrb[26].mxu0 }
 0x709   :  { %v3595_v42 = vadd.f32 %v4015_v41, %v1421_v18  ;;  %v1423_v47 = vpop.f32.mrb[11].mxu1  ;;  %v2791_v48 = vpop.f32.mrb[27].mxu0  ;;  %v1493_v21 = vadd.f32 %v1492_v40, %v4021_v0  ;;  %v1987_v18 = vld [vmem:[#allocation4 + $0x98] sm:$0xff]  ;;  %v1988_v40 = vld [vmem:[#allocation4 + $0xa0] sm:$0xff] }
 0x70a   :  { %v3597_v10 = vadd.f32 %v4017_v43, %v1423_v47  ;;  %v1989_v47 = vld [vmem:[#allocation4 + $0xa8] sm:$0xff]  ;;  %v1990_v48 = vld [vmem:[#allocation4 + $0xb0] sm:$0xff] }
 0x70b   :  { %v2272_v51 = vmul.f32 -1.442695, %v3595_v42  ;;  %v3526_v42 = vpack.c.bf16 %v1988_v40, %v1987_v18 }
 0x70c   :  { %v2273_v56 = vmul.f32 -1.442695, %v3597_v10  ;;  %v1991_v10 = vld [vmem:[#allocation4 + $0xb8] sm:$0xff] }
 0x70d   :  { %3681 = vpow2.f32 %v2272_v51  ;;  %v3530_v51 = vpack.c.bf16 %v1990_v48, %v1989_v47 }
 0x70e   :  { %3683 = vpow2.f32 %v2273_v56  ;;  %v1992_v56 = vld [vmem:[#allocation4 + $0xc0] sm:$0xff] }
 0x717   :  { %v3682_v57 = vpop.eup %3681 }
 0x718   :  { %v1500_v59 = vadd.f32 1.0, %v3682_v57  ;;  %v3684_v60 = vpop.eup %3683  ;;  %v3534_v57 = vpack.c.bf16 %v1992_v56, %v1991_v10  ;;  %v2127_v56 = vld [vmem:[#allocation4 + $0x150] sm:$0xff] }
 0x719   :  { %v1507_v63 = vadd.f32 1.0, %v3684_v60  ;;  %v1994_v60 = vld [vmem:[#allocation4 + $0xd0] sm:$0xff] }
 0x71a   :  { %3685 = vrcp.f32 %v1500_v59  ;;  %v1993_v59 = vld [vmem:[#allocation4 + $0xc8] sm:$0xff] }
 0x71b   :  { %3687 = vrcp.f32 %v1507_v63  ;;  %v3538_v63 = vpack.c.bf16 %v1994_v60, %v1993_v59  ;;  %v2286_v60 = vld [vmem:[#allocation4 + $0xd8] ss:$0 sm:$0xff] }
 0x724   :  { %v3686_v13 = vpop.eup %3685 }
 0x725   :  { %v1510_v5 = vmul.f32 %v3686_v13, %v1493_v21  ;;  %v3688_v12 = vpop.eup %3687 }
 0x726   :  { %v1513_v14 = vsub.f32 1.0, %v3688_v12  ;;  %v1515_v26 = vmul.f32 %v3688_v12, %v4200_v30 }
 0x727   :  { %v1511_v8 = vadd.f32 %v1510_v5, %v4007_v16  ;;  %v1841_v16 = vld [vmem:[#allocation4 + $0x18] sm:$0xff] }
 0x729   :  { %3689 = vtanh.f32 %v1511_v8 }
 0x733   :  { %v3690_v17 = vpop.eup %3689 }
 0x734   :  { %v1514_v6 = vmul.f32 %v3690_v17, %v1513_v14 }
 0x736   :  { %v4244_v29 = vadd.f32 %v1515_v26, %v1514_v6 }
 0x738   :  { %1582 = vmatmul.mubr.f32.vlgmr.msra.gmra.mrb[12].mxu1 %v4244_v29  ;;  %2825 = vmatmul.mubr.f32.vlgmr.msra.gmra.mrb[28].mxu0 %v4244_v29 }
 0x739   :  { %3441 = vmatpush1.bf16.msra.mxu1 %v3853_v35  ;;  %3472 = vmatpush3.bf16.msra.mxu0 %v3860_v46 }
 0x73a   :  { %3443 = vmatprep.subr.bf16.mxu1 %v3855_v38  ;;  %3473 = vmatprep.subr.bf16.mxu0 %v3766_v23 }
 0x73b   :  { %1743 = vmatprep.mubr.f32.mxu1 %v3765_v22  ;;  %2859 = vmatprep.mubr.msk.f32.mxu0 %vm3767_vm1, %v3765_v22  ;;  %v3494_v22 = vpack.c.bf16 %v4068_v19, %v4024_v37  ;;  %v1980_v37 = vld [vmem:[#allocation4 + $0x60] sm:$0xff]  ;;  %v1981_v19 = vld [vmem:[#allocation4 + $0x68] sm:$0xff] }
 0x73c   :  { %v3514_v36 = vpack.c.bf16 %v1982_v32, %v1981_v19  ;;  %v2121_v19 = vld [vmem:[#allocation4 + $0x120] sm:$0xff] }
 0x73d   :  { %3445 = vmatpush1.bf16.msra.mxu1 %v3865_v49  ;;  %3475 = vmatpush3.bf16.msra.mxu0 %v3888_v9 }
 0x73e   :  { %3447 = vmatprep.subr.bf16.mxu1 %v3869_v52  ;;  %3476 = vmatprep.subr.bf16.mxu0 %v3766_v23 }
 0x741   :  { %3449 = vmatpush1.bf16.msra.mxu1 %v3877_v62  ;;  %3478 = vmatpush3.bf16.msra.mxu0 %v3902_v24 }
 0x742   :  { %3451 = vmatprep.subr.bf16.mxu1 %v3882_v1  ;;  %3479 = vmatprep.subr.bf16.mxu0 %v3766_v23 }
 0x745   :  { %3453 = vmatpush1.bf16.msra.mxu1 %v3893_v11  ;;  %3481 = vmatpush3.bf16.msra.mxu0 %v3917_v33 }
 0x746   :  { %3455 = vmatprep.subr.bf16.mxu1 %v3899_v15  ;;  %3482 = vmatprep.subr.bf16.mxu0 %v3766_v23 }
 0x749   :  { %3457 = vmatpush1.bf16.msra.mxu1 %v3906_v25  ;;  %3484 = vmatpush3.bf16.msra.mxu0 %v3930_v44 }
 0x74a   :  { %3459 = vmatprep.subr.bf16.mxu1 %v3909_v28  ;;  %3485 = vmatprep.subr.bf16.mxu0 %v3766_v23 }
 0x74d   :  { %3461 = vmatpush1.bf16.msra.mxu1 %v3921_v34  ;;  %3487 = vmatpush3.bf16.msra.mxu0 %v3941_v54 }
 0x74e   :  { %3463 = vmatprep.subr.bf16.mxu1 %v3924_v39  ;;  %3488 = vmatprep.subr.bf16.mxu0 %v3766_v23 }
 0x751   :  { %3465 = vmatpush1.bf16.msra.mxu1 %v3934_v45  ;;  %3490 = vmatpush3.bf16.msra.mxu0 %v3952_v58  ;;  %v3498_v58 = vpack.c.bf16 %v4156_v53, %v4112_v3  ;;  %v1984_v3 = vld [vmem:[#allocation4 + $0x80] sm:$0xff] }
 0x752   :  { %3467 = vmatprep.subr.bf16.mxu1 %v3937_v50  ;;  %3491 = vmatprep.subr.bf16.mxu0 %v3766_v23  ;;  %v3518_v53 = vpack.c.bf16 %v1984_v3, %v1983_v2  ;;  %v2124_v2 = vld [vmem:[#allocation4 + $0x138] sm:$0xff] }
 0x755   :  { %3469 = vmatpush1.bf16.msra.mxu1 %v3945_v55  ;;  %3493 = vmatpush3.bf16.msra.mxu0 %v3960_v61  ;;  %v3502_v61 = vpack.c.bf16 %v4244_v29, %v4200_v30  ;;  %v3522_v30 = vpack.c.bf16 %v1986_v7, %v1985_v4  ;;  %v2126_v4 = vld [vmem:[#allocation4 + $0x148] sm:$0xff] }
 0x756   :  { %3495 = vmatprep.subr.bf16.mxu1 %v3494_v22 }
 0x80b   :  { %v1583_v35 = vpop.f32.mrb[12].mxu1  ;;  %v1654_v38 = vpop.f32.mrb[28].mxu0 }
 0x80c   :  { %v3599_v46 = vadd.f32 %v4015_v41, %v1583_v35  ;;  %v1585_v49 = vpop.f32.mrb[13].mxu1  ;;  %v2826_v52 = vpop.f32.mrb[29].mxu0  ;;  %v1655_v25 = vadd.f32 %v1654_v38, %v4021_v0 }
 0x80d   :  { %v3601_v1 = vadd.f32 %v4017_v43, %v1585_v49 }
 0x80e   :  { %v2274_v62 = vmul.f32 -1.442695, %v3599_v46 }
 0x80f   :  { %v2275_v9 = vmul.f32 -1.442695, %v3601_v1 }
 0x810   :  { %3691 = vpow2.f32 %v2274_v62 }
 0x811   :  { %3693 = vpow2.f32 %v2275_v9 }
 0x81a   :  { %v3692_v23 = vpop.eup %3691 }
 0x81b   :  { %v1662_v11 = vadd.f32 1.0, %v3692_v23  ;;  %v3694_v15 = vpop.eup %3693 }
 0x81c   :  { %v1669_v24 = vadd.f32 1.0, %v3694_v15  ;;  %v1842_v15 = vld [vmem:[#allocation4 + $0x20] sm:$0xff] }
 0x81d   :  { %3695 = vrcp.f32 %v1662_v11 }
 0x81e   :  { %3697 = vrcp.f32 %v1669_v24  ;;  %v1843_v24 = vld [vmem:[#allocation4 + $0x28] sm:$0xff] }
 0x827   :  { %v3696_v28 = vpop.eup %3695 }
 0x828   :  { %v1672_v33 = vmul.f32 %v3696_v28, %v1655_v25  ;;  %v3698_v39 = vpop.eup %3697  ;;  %v1846_v25 = vld [vmem:[#allocation4 + $0x40] sm:$0xff]  ;;  %v1847_v28 = vld [vmem:[#allocation4 + $0x48] sm:$0xff] }
 0x829   :  { %v1675_v44 = vsub.f32 1.0, %v3698_v39  ;;  %v1677_v54 = vmul.f32 %v3698_v39, %v4244_v29  ;;  %v2114_v39 = vld [vmem:[#allocation4 + $0xe8] sm:$0xff] }
 0x82a   :  { %v1673_v34 = vadd.f32 %v1672_v33, %v4013_v27  ;;  %v1979_v27 = vld [vmem:[#allocation4 + $0x58] sm:$0xff]  ;;  %v1848_v33 = vld [vmem:[#allocation4 + $0x50] sm:$0xff] }
 0x82b   :  { %v3510_v31 = vpack.c.bf16 %v1980_v37, %v1979_v27  ;;  %v2120_v27 = vld [vmem:[#allocation4 + $0x118] sm:$0xff] }
 0x82c   :  { %3699 = vtanh.f32 %v1673_v34  ;;  %v2113_v34 = vld [vmem:[#allocation4 + $0xe0] sm:$0xff] }
 0x82d   :  { %3511 = vmatprep.subr.bf16.mxu0 %v3510_v31 }
 0x836   :  { %v3700_v45 = vpop.eup %3699 }
 0x837   :  { %v1676_v50 = vmul.f32 %v3700_v45, %v1675_v44  ;;  %v2115_v44 = vld [vmem:[#allocation4 + $0xf0] sm:$0xff]  ;;  %v3542_v45 = vpack.c.bf16 %v2114_v39, %v2113_v34 }
 0x839   :  { %v4288_v55 = vadd.f32 %v1677_v54, %v1676_v50  ;;  %v2116_v50 = vld [vmem:[#allocation4 + $0xf8] sm:$0xff] }
 0x83a   :  { %v3546_v54 = vpack.c.bf16 %v2116_v50, %v2115_v44 }
 0x83b   :  { %1744 = vmatmul.mubr.f32.vlgmr.msra.gmra.mrb[14].mxu1 %v4288_v55  ;;  %2860 = vmatmul.mubr.f32.vlgmr.msra.gmra.mrb[30].mxu0 %v4288_v55 }
 0x83c   :  { %3497 = vmatpush3.bf16.msra.mxu1 %v3494_v22  ;;  %2878 = vmatprep.mubr.msk.f32.mxu1 %vm1849_vm2, %v1841_v16  ;;  %v2119_v16 = vld [vmem:[#allocation4 + $0x110] sm:$0xff] }
 0x83d   :  { %3499 = vmatprep.subr.bf16.mxu1 %v3498_v58  ;;  %3513 = vmatpush3.bf16.msra.mxu0 %v3510_v31  ;;  %v3554_v37 = vpack.c.bf16 %v2120_v27, %v2119_v16  ;;  %v2122_v31 = vld [vmem:[#allocation4 + $0x128] sm:$0xff] }
 0x83e   :  { %3515 = vmatprep.subr.bf16.mxu0 %v3514_v36  ;;  %v3558_v32 = vpack.c.bf16 %v2122_v31, %v2121_v19 }
 0x840   :  { %3501 = vmatpush3.bf16.msra.mxu1 %v3498_v58  ;;  %v2118_v58 = vld [vmem:[#allocation4 + $0x108] sm:$0xff] }
 0x841   :  { %3503 = vmatprep.subr.bf16.mxu1 %v3502_v61  ;;  %3517 = vmatpush3.bf16.msra.mxu0 %v3514_v36  ;;  %v2123_v36 = vld [vmem:[#allocation4 + $0x130] sm:$0xff] }
 0x842   :  { %3519 = vmatprep.subr.bf16.mxu0 %v3518_v53  ;;  %v3562_v3 = vpack.c.bf16 %v2124_v2, %v2123_v36 }
 0x844   :  { %3505 = vmatpush3.bf16.msra.mxu1 %v3502_v61 }
 0x845   :  { %3521 = vmatpush3.bf16.msra.mxu0 %v3518_v53  ;;  %v2125_v53 = vld [vmem:[#allocation4 + $0x140] sm:$0xff] }
 0x846   :  { %3523 = vmatprep.subr.bf16.mxu0 %v3522_v30  ;;  %v3566_v7 = vpack.c.bf16 %v2126_v4, %v2125_v53 }
 0x849   :  { %3525 = vmatpush3.bf16.msra.mxu0 %v3522_v30 }
 0x84a   :  { %3527 = vmatprep.subr.bf16.mxu0 %v3526_v42 }
 0x84d   :  { %3529 = vmatpush3.bf16.msra.mxu0 %v3526_v42 }
 0x84e   :  { %3531 = vmatprep.subr.bf16.mxu0 %v3530_v51 }
 0x851   :  { %3533 = vmatpush3.bf16.msra.mxu0 %v3530_v51 }
 0x852   :  { %3535 = vmatprep.subr.bf16.mxu0 %v3534_v57 }
 0x855   :  { %3537 = vmatpush3.bf16.msra.mxu0 %v3534_v57  ;;  %v2128_v57 = vld [vmem:[#allocation4 + $0x158] sm:$0xff] }
 0x856   :  { %3539 = vmatprep.subr.bf16.mxu0 %v3538_v63  ;;  %v3570_v59 = vpack.c.bf16 %v2128_v57, %v2127_v56 }
 0x859   :  { %3541 = vmatpush3.bf16.msra.mxu0 %v3538_v63 }
 0x90e   :  { %v1745_v21 = vpop.f32.mrb[14].mxu1  ;;  %v1816_v13 = vpop.f32.mrb[30].mxu0 }
 0x90f   :  { %v3603_v5 = vadd.f32 %v4015_v41, %v1745_v21  ;;  %v1747_v8 = vpop.f32.mrb[15].mxu1  ;;  %v2861_v12 = vpop.f32.mrb[31].mxu0  ;;  %v1817_v38 = vadd.f32 %v1816_v13, %v4021_v0  ;;  %v1844_v0 = vld [vmem:[#allocation4 + $0x30] sm:$0xff] }
 0x910   :  { %v3605_v17 = vadd.f32 %v4017_v43, %v1747_v8 }
 0x911   :  { %v2276_v14 = vmul.f32 -1.442695, %v3603_v5 }
 0x912   :  { %v2277_v6 = vmul.f32 -1.442695, %v3605_v17 }
 0x913   :  { %3701 = vpow2.f32 %v2276_v14 }
 0x914   :  { %3703 = vpow2.f32 %v2277_v6 }
 0x91d   :  { %v3702_v26 = vpop.eup %3701 }
 0x91e   :  { %v1824_v29 = vadd.f32 1.0, %v3702_v26  ;;  %v3704_v22 = vpop.eup %3703 }
 0x91f   :  { %v1831_v35 = vadd.f32 1.0, %v3704_v22 }
 0x920   :  { %3705 = vrcp.f32 %v1824_v29 }
 0x921   :  { %3707 = vrcp.f32 %v1831_v35 }
 0x92a   :  { %v3706_v46 = vpop.eup %3705 }
 0x92b   :  { %v1834_v49 = vmul.f32 %v3706_v46, %v1817_v38  ;;  %v3708_v52 = vpop.eup %3707 }
 0x92c   :  { %v1837_v62 = vsub.f32 1.0, %v3708_v52  ;;  %v1839_v9 = vmul.f32 %v3708_v52, %v4288_v55 }
 0x92d   :  { %v1835_v41 = vadd.f32 %v1834_v49, %v4011_v20  ;;  %v1845_v20 = vld [vmem:[#allocation4 + $0x38] sm:$0xff] }
 0x92f   :  { %3709 = vtanh.f32 %v1835_v41 }
 0x939   :  { %v3710_v1 = vpop.eup %3709 }
 0x93a   :  { %v1838_v43 = vmul.f32 %v3710_v1, %v1837_v62 }
 0x93c   :  { %v1840_v23 = vadd.f32 %v1839_v9, %v1838_v43 }
 0x93e   :  { %v3506_v11 = vpack.c.bf16 %v1840_v23, %v4288_v55  ;;  %v2117_v55 = vld [vmem:[#allocation4 + $0x100] sm:$0xff] }
 0x93f   :  { %v3550_v61 = vpack.c.bf16 %v2118_v58, %v2117_v55 }
 0x940   :  { %3507 = vmatprep.subr.bf16.mxu1 %v3506_v11 }
 0x941   :  { %3509 = vmatpush3.bf16.msra.mxu1 %v3506_v11 }
 0x942   :  { %3543 = vmatprep.subr.bf16.mxu1 %v3542_v45 }
 0x944   :  { %2879 = vmatmul.mubr.msk.f32.vlgmr.msra.gmra.mrb[16].mxu1 %vm1849_vm2, %v1842_v15  ;;  %v2287_v15 = vld [vmem:[#allocation4 + $0x160] ss:$0 sm:$0xff] }
 0x945   :  { %2881 = vmatprep.mubr.msk.f32.mxu1 %vm1849_vm2, %v1843_v24  ;;  %3545 = vmatpush3.bf16.msra.mxu1 %v3542_v45 }
 0x946   :  { %3547 = vmatprep.subr.bf16.mxu1 %v3546_v54 }
 0x948   :  { %2882 = vmatmul.mubr.msk.f32.gmra.mrb[18].mxu1 %vm1849_vm2, %v1844_v0 }
 0x949   :  { %2884 = vmatprep.mubr.msk.f32.mxu1 %vm1849_vm2, %v1845_v20  ;;  %3549 = vmatpush3.bf16.msra.mxu1 %v3546_v54 }
 0x94a   :  { %3551 = vmatprep.subr.bf16.mxu1 %v3550_v61 }
 0x94c   :  { %2885 = vmatmul.mubr.msk.f32.gmra.mrb[20].mxu1 %vm1849_vm2, %v1846_v25 }
 0x94d   :  { %2887 = vmatprep.mubr.msk.f32.mxu1 %vm1849_vm2, %v1847_v28  ;;  %3553 = vmatpush3.bf16.msra.mxu1 %v3550_v61 }
 0x94e   :  { %3555 = vmatprep.subr.bf16.mxu1 %v3554_v37 }
 0x950   :  { %2888 = vmatmul.mubr.msk.f32.gmra.mrb[22].mxu1 %vm1849_vm2, %v1848_v33 }
 0x951   :  { %3557 = vmatpush3.bf16.msra.mxu1 %v3554_v37 }
 0x952   :  { %3559 = vmatprep.subr.bf16.mxu1 %v3558_v32 }
 0x955   :  { %3561 = vmatpush3.bf16.msra.mxu1 %v3558_v32 }
 0x956   :  { %3563 = vmatprep.subr.bf16.mxu1 %v3562_v3 }
 0x959   :  { %3565 = vmatpush3.bf16.msra.mxu1 %v3562_v3 }
 0x95a   :  { %3567 = vmatprep.subr.bf16.mxu1 %v3566_v7 }
 0x95d   :  { %3569 = vmatpush3.bf16.msra.mxu1 %v3566_v7 }
 0x95e   :  { %3571 = vmatprep.subr.bf16.mxu1 %v3570_v59 }
 0x961   :  { %3573 = vmatpush3.bf16.msra.mxu1 %v3570_v59 }
 0xa17   :  { %v2880_v30 = vpop.f32.mrb[16].mxu1 }
 0xa18   :  { %v1940_v18 = vpop.f32.mrb[17].mxu1 }
 0xa19   :  { %2922 = vmatprep.mubr.f32.mxu0 %v1940_v18 }
 0xa1a   :  { %2923 = vmatmul.mubr.f32.vlgmr.msra.gmra.mrb[32].mxu0 %v2880_v30 }
 0xa1b   :  { %v2883_v40 = vpop.f32.mrb[18].mxu1 }
 0xa1c   :  { %v1950_v42 = vpop.f32.mrb[19].mxu1 }
 0xa1d   :  { %2925 = vmatprep.mubr.f32.mxu0 %v1950_v42 }
 0xa1e   :  { %2926 = vmatmul.mubr.f32.gmra.mrb[34].mxu0 %v2883_v40 }
 0xa1f   :  { %v2886_v47 = vpop.f32.mrb[20].mxu1 }
 0xa20   :  { %v1960_v48 = vpop.f32.mrb[21].mxu1 }
 0xa21   :  { %2928 = vmatprep.mubr.f32.mxu0 %v1960_v48 }
 0xa22   :  { %2929 = vmatmul.mubr.f32.gmra.mrb[36].mxu0 %v2886_v47 }
 0xa23   :  { %v2889_v51 = vpop.f32.mrb[22].mxu1 }
 0xa24   :  { %v1970_v10 = vpop.f32.mrb[23].mxu1 }
 0xa25   :  { %2931 = vmatprep.mubr.f32.mxu0 %v1970_v10 }
 0xa26   :  { %2932 = vmatmul.mubr.f32.gmra.mrb[38].mxu0 %v2889_v51 }
 0xaed   :  { %v2924_v63 = vpop.f32.mrb[32].mxu0 }
 0xaee   :  { %v2072_v21 = vadd.f32 %v2924_v63, %v2286_v60  ;;  %v2066_v13 = vpop.f32.mrb[33].mxu0 }
 0xaef   :  { %v2067_v5 = vadd.f32 %v2286_v60, %v2066_v13 }
 0xaf0   :  { %v2106_v14 = vmax.f32 %v2072_v21, 0.0 }
 0xaf1   :  { %v2105_v8 = vmax.f32 %v2067_v5, 0.0  ;;  %v2927_v12 = vpop.f32.mrb[34].mxu0 }
 0xaf2   :  { %v2082_v17 = vadd.f32 %v2927_v12, %v2286_v60  ;;  %v2076_v6 = vpop.f32.mrb[35].mxu0 }
 0xaf3   :  { %v2077_v26 = vadd.f32 %v2286_v60, %v2076_v6  ;;  %2966 = vmatprep.mubr.f32.mxu1 %v2105_v8 }
 0xaf4   :  { %2967 = vmatmul.mubr.f32.vlgmr.msra.gmra.mrb[24].mxu1 %v2106_v14  ;;  %v2108_v35 = vmax.f32 %v2082_v17, 0.0 }
 0xaf5   :  { %v2107_v29 = vmax.f32 %v2077_v26, 0.0  ;;  %v2930_v22 = vpop.f32.mrb[36].mxu0 }
 0xaf6   :  { %v2092_v38 = vadd.f32 %v2930_v22, %v2286_v60  ;;  %v2086_v46 = vpop.f32.mrb[37].mxu0 }
 0xaf7   :  { %v2087_v49 = vadd.f32 %v2286_v60, %v2086_v46  ;;  %2969 = vmatprep.mubr.f32.mxu1 %v2107_v29 }
 0xaf8   :  { %2970 = vmatmul.mubr.f32.gmra.mrb[26].mxu1 %v2108_v35  ;;  %v2110_v62 = vmax.f32 %v2092_v38, 0.0 }
 0xaf9   :  { %v2109_v41 = vmax.f32 %v2087_v49, 0.0  ;;  %v2933_v52 = vpop.f32.mrb[38].mxu0 }
 0xafa   :  { %v2102_v1 = vadd.f32 %v2933_v52, %v2286_v60  ;;  %v2096_v43 = vpop.f32.mrb[39].mxu0 }
 0xafb   :  { %v2097_v9 = vadd.f32 %v2286_v60, %v2096_v43  ;;  %2972 = vmatprep.mubr.f32.mxu1 %v2109_v41 }
 0xafc   :  { %2973 = vmatmul.mubr.f32.gmra.mrb[28].mxu1 %v2110_v62  ;;  %v2112_v11 = vmax.f32 %v2102_v1, 0.0 }
 0xafd   :  { %v2111_v23 = vmax.f32 %v2097_v9, 0.0 }
 0xaff   :  { %2975 = vmatprep.mubr.f32.mxu1 %v2111_v23 }
 0xb00   :  { %2976 = vmatmul.mubr.f32.gmra.mrb[30].mxu1 %v2112_v11 }
 0xbc7   :  { %v2968_v24 = vpop.f32.mrb[24].mxu1 }
 0xbc8   :  { %v2206_v0 = vadd.f32 %v2968_v24, %v2287_v15  ;;  %v2200_v20 = vpop.f32.mrb[25].mxu1 }
 0xbc9   :  { %v2201_v25 = vadd.f32 %v2287_v15, %v2200_v20 }
 0xbca   :  { %2240 = vst [vmem:[%s4337_s3 + $0x8] sm:$0xff] %v2206_v0 }
 0xbcb   :  { %2239 = vst [vmem:[%s4337_s3] sm:$0xff] %v2201_v25  ;;  %v2971_v28 = vpop.f32.mrb[26].mxu1 }
 0xbcc   :  { %v2216_v33 = vadd.f32 %v2971_v28, %v2287_v15  ;;  %v2210_v34 = vpop.f32.mrb[27].mxu1 }
 0xbcd   :  { %v2211_v39 = vadd.f32 %v2287_v15, %v2210_v34 }
 0xbce   :  { %2242 = vst [vmem:[%s4337_s3 + $0x18] sm:$0xff] %v2216_v33 }
 0xbcf   :  { %2241 = vst [vmem:[%s4337_s3 + $0x10] sm:$0xff] %v2211_v39  ;;  %v2974_v44 = vpop.f32.mrb[28].mxu1 }
 0xbd0   :  { %v2226_v45 = vadd.f32 %v2974_v44, %v2287_v15  ;;  %v2220_v50 = vpop.f32.mrb[29].mxu1 }
 0xbd1   :  { %v2221_v54 = vadd.f32 %v2287_v15, %v2220_v50 }
 0xbd2   :  { %2244 = vst [vmem:[%s4337_s3 + $0x28] sm:$0xff] %v2226_v45 }
 0xbd3   :  { %2243 = vst [vmem:[%s4337_s3 + $0x20] sm:$0xff] %v2221_v54  ;;  %v2977_v55 = vpop.f32.mrb[30].mxu1 }
 0xbd4   :  { %v2236_v58 = vadd.f32 %v2977_v55, %v2287_v15  ;;  %v2230_v61 = vpop.f32.mrb[31].mxu1 }
 0xbd5   :  { %v2231_v16 = vadd.f32 %v2287_v15, %v2230_v61 }
 0xbd6   :  { %2246 = vst [vmem:[%s4337_s3 + $0x38] sm:$0xff] %v2236_v58 }
 0xbd7   :  { %2245 = vst [vmem:[%s4337_s3 + $0x30] sm:$0xff] %v2231_v16 }
 0xbd8   :  { %2251 = vsyncpa [#allocation3], 1 }
 0xbd9   :  { %2252 = vsyncpa [#allocation5], 1 }

</bundles_post_ra>
